<compile_context>
chip_gen: v5e
topology: v5e:2x2
jax: 0.10.0
libtpu: 0.0.40
codegen_flags: <defaults>
</compile_context>

<pallas_src>
import functools

import jax
import jax.numpy as jnp
import numpy as np
from jax.experimental import pallas as pl
from jax.experimental.pallas import tpu as pltpu

LEAKY_SLOPE = 0.1
_VMEM_LIMIT = 48 * 1024 * 1024          # safe on v7x (64 MiB phys); v5e/v6e have 128 MiB
_SREL_BLOCK_BUDGET = 24 * 1024 * 1024   # double-buffered s_rel output block (kernel B)
_TH_BLOCK_BUDGET = 16 * 1024 * 1024     # double-buffered th output block (kernel A)


def _round_up(x, m):
    return (x + m - 1) // m * m


# ------------------------------- kernels -------------------------------------


def _head_precompute_kernel(xb_ref, xp_ref, wht_ref, whb_ref, bh_ref, wrelf_ref,
                            arc_h_ref, th_ref, *, ah):
    """Head-side (per head-token y) features, computed exactly once per token.

    arc_h_ref[t, :]      = LeakyReLU(x_t @ W_arc_h + b_arc_h)                 (AH)
    th_ref[t, o*RD + i]  = sum_j LeakyReLU(x_t @ W_rel_h + b_rel_h)_aug[j]
                                  * W_rel[o, i, j]                            (O*RD)
    """
    h = (jnp.dot(xb_ref[...], wht_ref[...], preferred_element_type=jnp.float32)
         + jnp.dot(xp_ref[...], whb_ref[...], preferred_element_type=jnp.float32)
         + bh_ref[...])
    # MLP = Linear + LeakyReLU(0.1); SharedDropout is identity in eval.
    h = jnp.where(h > 0, h, LEAKY_SLOPE * h)                      # (rows, AH+RH) f32
    arc_h_ref[...] = h[:, :ah].astype(jnp.bfloat16)
    rel_h = h[:, ah:].astype(jnp.bfloat16)                        # (rows, RH)
    # rel Biaffine stage 1 over ALL labels in one MXU matmul (N = O*RD).
    th_ref[...] = jnp.dot(rel_h, wrelf_ref[...],
                          preferred_element_type=jnp.float32).astype(jnp.bfloat16)


def _dep_biaffine_kernel(xb_ref, xp_ref, mask_ref, wdt_ref, wdb_ref, bd_ref,
                         warc_ref, arc_h_ref, th_ref, s_arc_ref, s_rel_ref, *, ad):
    """Dep-side MLP + both Biaffine attentions for one (sentence, seq-tile)."""
    # dep MLP heads only for this tile's TX query rows -> each token done once.
    h = (jnp.dot(xb_ref[...], wdt_ref[...], preferred_element_type=jnp.float32)
         + jnp.dot(xp_ref[...], wdb_ref[...], preferred_element_type=jnp.float32)
         + bd_ref[...])
    h = jnp.where(h > 0, h, LEAKY_SLOPE * h)                      # (TX, AD+RD) f32
    arc_d = h[:, :ad].astype(jnp.bfloat16)                        # (TX, AD)
    rel_d = h[:, ad:].astype(jnp.bfloat16)                        # (TX, RD)

    # arc Biaffine: stage 1, then stage 2 against the cached head activations.
    t = jnp.dot(arc_d, warc_ref[...], preferred_element_type=jnp.float32)
    s_arc = jax.lax.dot_general(
        t.astype(jnp.bfloat16), arc_h_ref[...],
        dimension_numbers=(((1,), (1,)), ((), ())),
        preferred_element_type=jnp.float32)                       # (TX, S)
    # masked_fill_(~mask.unsqueeze(1), -inf): mask padded *head* columns.
    s_arc_ref[...] = jnp.where(mask_ref[0] > 0.5, s_arc, -jnp.inf)

    # rel Biaffine stage 2: ONE dot over all labels.  th rows are (y, o) pairs,
    # so the (TX, S*O) result is already in the final [x, y, o] column order
    # and the store is a single lane-dense block.
    s_rel_ref[...] = jax.lax.dot_general(
        rel_d, th_ref[...],
        dimension_numbers=(((1,), (1,)), ((), ())),
        preferred_element_type=jnp.float32)                       # (TX, S*O)


# ----------------------- weight packing / preparation ------------------------


def pack_params(params, *, d_bert):
    """Folds Biaffine ones-columns into the MLPs, pads widths to 128 lanes,
    groups the MLP heads by role (dep vs head), splits each fused weight into
    bert/pos row blocks, flattens the rel Biaffine weight over all labels
    (no label padding), and casts everything to bf16 (biases stay f32)."""
    w_arc_d, b_arc_d = params["w_arc_d"], params["b_arc_d"]
    w_arc_h, b_arc_h = params["w_arc_h"], params["b_arc_h"]
    w_rel_d, b_rel_d = params["w_rel_d"], params["b_rel_d"]
    w_rel_h, b_rel_h = params["w_rel_h"], params["b_rel_h"]
    w_arc_attn = params["w_arc_attn"]          # (A+1, A)
    w_rel_attn = params["w_rel_attn"]          # (O, R+1, R+1)

    E, A = w_arc_d.shape
    R = w_rel_d.shape[1]
    O = w_rel_attn.shape[0]

    AD = _round_up(A + 1, 128)     # arc-dep width (incl. bias-ones column)
    AH = _round_up(A, 128)         # arc-head width (bias_y=False)
    RD = _round_up(R + 1, 128)     # rel-dep width
    RH = _round_up(R + 1, 128)     # rel-head width

    def head(w, b, add_ones, width):
        n = w.shape[1]
        wp = jnp.zeros((E, width), jnp.float32).at[:, :n].set(w)
        bp = jnp.zeros((width,), jnp.float32).at[:n].set(b)
        if add_ones:
            # zero weight column + bias 1.0 -> LeakyReLU(1) == 1 (Biaffine bias).
            bp = bp.at[n].set(1.0)
        return wp, bp

    w_ad, b_ad = head(w_arc_d, b_arc_d, True, AD)
    w_rd, b_rd = head(w_rel_d, b_rel_d, True, RD)
    w_ah, b_ah = head(w_arc_h, b_arc_h, False, AH)
    w_rh, b_rh = head(w_rel_h, b_rel_h, True, RH)

    # dep-side fused weight: columns [arc_d | rel_d]; head-side: [arc_h | rel_h].
    w_dep = jnp.concatenate([w_ad, w_rd], axis=1)                 # (E, AD+RD)
    b_dep = jnp.concatenate([b_ad, b_rd])[None, :]                # (1, AD+RD) f32
    w_head = jnp.concatenate([w_ah, w_rh], axis=1)                # (E, AH+RH)
    b_head = jnp.concatenate([b_ah, b_rh])[None, :]               # (1, AH+RH) f32

    # arc Biaffine weight, zero-padded to (AD, AH).
    warc = jnp.zeros((AD, AH), jnp.float32).at[:A + 1, :A].set(w_arc_attn)

    # rel Biaffine weight flattened for ONE stage-1 matmul over all labels:
    #   wrel_flat[j, o*RD + i] = w_rel_attn[o, i, j]   (zero padded, no label pad)
    wrel = jnp.zeros((O, RD, RH), jnp.float32).at[:, :R + 1, :R + 1].set(w_rel_attn)
    wrel_flat = jnp.transpose(wrel, (2, 0, 1)).reshape(RH, O * RD)

    bf16 = lambda a: a.astype(jnp.bfloat16)
    kernel_params = {
        "w_dep_top": bf16(w_dep[:d_bert]), "w_dep_bot": bf16(w_dep[d_bert:]),
        "b_dep": b_dep,
        "w_head_top": bf16(w_head[:d_bert]), "w_head_bot": bf16(w_head[d_bert:]),
        "b_head": b_head,
        "w_arc": bf16(warc),
        "w_rel_flat": bf16(wrel_flat),
    }
    dims = {"ad": AD, "ah": AH, "rd": RD, "rh": RH, "n_rels": O}
    return kernel_params, dims


# ------------------------------ pallas wrappers -------------------------------


def _weight_spec(block_shape, index_map, single_buffered):
    """Constant-index weight blocks: single-buffer them when supported (they are
    never re-fetched, so the second pipeline buffer is pure VMEM waste)."""
    if single_buffered:
        return pl.BlockSpec(block_shape, index_map, pipeline_mode=pl.Buffered(1))
    return pl.BlockSpec(block_shape, index_map)


def _call_with_fallback(build_and_call):
    # TODO(synk): pl.Buffered(1) single-buffering of constant weight blocks is a
    # pure VMEM optimization; fall back to default double buffering if this jax
    # version rejects it.
    try:
        return build_and_call(True)
    except Exception:
        return build_and_call(False)


def _run_head_precompute(xb2, xp2, kp, dims, B, S, tba, single_buffer_weights):
    DB, NP = xb2.shape[1], xp2.shape[1]
    AH, RH, RD, O = dims["ah"], dims["rh"], dims["rd"], dims["n_rels"]
    HEAD = AH + RH
    rows = tba * S
    wspec = functools.partial(_weight_spec, single_buffered=single_buffer_weights)
    kernel = functools.partial(_head_precompute_kernel, ah=AH)
    return pl.pallas_call(
        kernel,
        grid=(B // tba,),
        in_specs=[
            pl.BlockSpec((rows, DB), lambda b: (b, 0)),
            pl.BlockSpec((rows, NP), lambda b: (b, 0)),
            wspec((DB, HEAD), lambda b: (0, 0)),
            wspec((NP, HEAD), lambda b: (0, 0)),
            wspec((1, HEAD), lambda b: (0, 0)),
            wspec((RH, O * RD), lambda b: (0, 0)),
        ],
        out_specs=(
            pl.BlockSpec((rows, AH), lambda b: (b, 0)),
            pl.BlockSpec((rows, O * RD), lambda b: (b, 0)),
        ),
        out_shape=(
            jax.ShapeDtypeStruct((B * S, AH), jnp.bfloat16),
            jax.ShapeDtypeStruct((B * S, O * RD), jnp.bfloat16),
        ),
        compiler_params=pltpu.CompilerParams(
            dimension_semantics=("parallel",),
            vmem_limit_bytes=_VMEM_LIMIT),
    )(xb2, xp2, kp["w_head_top"], kp["w_head_bot"], kp["b_head"], kp["w_rel_flat"])


def _run_dep_biaffine(xb2, xp2, mask3, arc_h, th2, kp, dims, B, S, tx,
                      single_buffer_weights):
    DB, NP = xb2.shape[1], xp2.shape[1]
    AD, AH, RD, O = dims["ad"], dims["ah"], dims["rd"], dims["n_rels"]
    DEP = AD + RD
    nx = S // tx
    row_map = lambda b, x: (b * nx + x, 0)
    wspec = functools.partial(_weight_spec, single_buffered=single_buffer_weights)
    kernel = functools.partial(_dep_biaffine_kernel, ad=AD)
    return pl.pallas_call(
        kernel,
        grid=(B, nx),
        in_specs=[
            pl.BlockSpec((tx, DB), row_map),                    # dep x rows only
            pl.BlockSpec((tx, NP), row_map),
            pl.BlockSpec((1, 1, S), lambda b, x: (b, 0, 0)),    # mask (per sentence)
            wspec((DB, DEP), lambda b, x: (0, 0)),
            wspec((NP, DEP), lambda b, x: (0, 0)),
            wspec((1, DEP), lambda b, x: (0, 0)),
            wspec((AD, AH), lambda b, x: (0, 0)),
            pl.BlockSpec((S, AH), lambda b, x: (b, 0)),         # cached head feats
            pl.BlockSpec((S * O, RD), lambda b, x: (b, 0)),     # cached rel stage 1
        ],
        out_specs=(
            pl.BlockSpec((tx, S), row_map),
            pl.BlockSpec((tx, S * O), row_map),
        ),
        out_shape=(
            jax.ShapeDtypeStruct((B * S, S), jnp.float32),
            jax.ShapeDtypeStruct((B * S, S * O), jnp.float32),
        ),
        compiler_params=pltpu.CompilerParams(
            dimension_semantics=("parallel", "arbitrary"),
            vmem_limit_bytes=_VMEM_LIMIT),
    )(xb2, xp2, mask3, kp["w_dep_top"], kp["w_dep_bot"], kp["b_dep"],
      kp["w_arc"], arc_h, th2)


def biaffine_heads_pallas(x_bert, x_pos, mask_f, kp, dims, *,
                          seq_tile=None, head_batch_tile=None):
    """MLP heads + both Biaffine attentions + arc masking, as two Pallas calls.

    x_bert: [B, S, d_bert] bf16, x_pos: [B, S, n_pos] bf16, mask_f: [B, S] f32.
    Returns (s_arc [B, S, S] f32, s_rel [B, S, S, n_rels] f32).
    """
    B, S, DB = x_bert.shape
    NP = x_pos.shape[-1]
    assert S % 8 == 0, "seq length must be a multiple of 8 (sublane tile)"
    # TODO(synk): production callers should pad S to a multiple of 128 so the
    # s_arc store (last dim S) is lane-dense; the kernels are correct either way.
    AD, AH, RD, RH, O = (dims["ad"], dims["ah"], dims["rd"], dims["rh"],
                         dims["n_rels"])

    xb2 = x_bert.reshape(B * S, DB)
    xp2 = x_pos.reshape(B * S, NP)
    mask3 = mask_f.reshape(B, 1, S)

    # ---- tile sizing: explicit VMEM budgets + >=2 parallel steps for v7x ----
    if head_batch_tile is None:
        row_cap = max(S, min(2048, _TH_BLOCK_BUDGET // max(1, 4 * O * RD)))
        head_batch_tile = 1
        for t in range(1, B + 1):
            if B % t != 0:
                continue
            if B >= 2 and B // t < 2:       # keep both v7x TensorCores busy
                continue
            if t * S <= row_cap:
                head_batch_tile = t
    tba = head_batch_tile
    assert B % tba == 0

    if seq_tile is None:
        seq_tile = 8
        for t in range(8, min(S, 256) + 1, 8):
            if S % t == 0 and 2 * t * S * O * 4 <= _SREL_BLOCK_BUDGET:
                seq_tile = t
    tx = seq_tile
    assert S % tx == 0 and tx % 8 == 0

    # ---- kernel A: head-side MLP + rel Biaffine stage 1 (once per token) ----
    arc_h, th_flat = _call_with_fallback(
        lambda sb: _run_head_precompute(xb2, xp2, kp, dims, B, S, tba, sb))
    # Free row-major relabeling in HBM: rows (b*S + y), cols (o*RD + i)
    #   -> rows (b*S*O + y*O + o), cols (i).  No transpose anywhere.
    th2 = th_flat.reshape(B * S * O, RD)

    # ---- kernel B: dep-side MLP + arc Biaffine + fused rel stage 2 ----------
    s_arc2, s_rel2 = _call_with_fallback(
        lambda sb: _run_dep_biaffine(xb2, xp2, mask3, arc_h, th2, kp, dims,
                                     B, S, tx, sb))

    # Both reshapes are free row-major reinterpretations: s_rel columns are
    # already ordered (head-token y, label o), i.e. the PyTorch
    # permute(0, 2, 3, 1) layout.  No slicing needed (no label padding).
    return s_arc2.reshape(B, S, S), s_rel2.reshape(B, S, S, O)


# ------------------------- parameters / full forward --------------------------


def init_params(key, *, n_words, d_bert, n_feats_pos, n_mlp_arc, n_mlp_rel, n_rels):
    """Deterministic synthetic parameters in module-faithful shapes (f32)."""
    E = d_bert + n_feats_pos    # encoder_n_out = encoder.n_out + n_feats_pos
    ks = jax.random.split(key, 11)
    rnd = lambda k, shape: (0.1 * jax.random.normal(k, shape)).astype(jnp.float32)
    return {
        "bert_table": rnd(ks[0], (n_words, d_bert)),
        "w_arc_d": rnd(ks[1], (E, n_mlp_arc)), "b_arc_d": rnd(ks[2], (n_mlp_arc,)),
        "w_arc_h": rnd(ks[3], (E, n_mlp_arc)), "b_arc_h": rnd(ks[4], (n_mlp_arc,)),
        "w_rel_d": rnd(ks[5], (E, n_mlp_rel)), "b_rel_d": rnd(ks[6], (n_mlp_rel,)),
        "w_rel_h": rnd(ks[7], (E, n_mlp_rel)), "b_rel_h": rnd(ks[8], (n_mlp_rel,)),
        "w_arc_attn": rnd(ks[9], (n_mlp_arc + 1, n_mlp_arc)),
        "w_rel_attn": rnd(ks[10], (n_rels, n_mlp_rel + 1, n_mlp_rel + 1)),
    }


def _encode_inputs(words, embedded_pos, params):
    # TODO(synk): BertEmbedding (pretrained transformer) has no clean Pallas
    # equivalent; stand-in is a deterministic embedding-table lookup.
    x_bert = jnp.take(params["bert_table"], words, axis=0).astype(jnp.bfloat16)
    x_pos = embedded_pos.astype(jnp.bfloat16)
    return x_bert, x_pos


def biaffine_dependency_forward(words, feats, embedded_pos, params, kp, dims,
                                pad_index=0):
    """Mirrors BiaffineDependencyModel.forward for the encoder='bert' path (eval)."""
    del feats  # feats are unused by encode() when encoder_type == 'bert'
    mask_f = (words != pad_index).astype(jnp.float32)
    x_bert, x_pos = _encode_inputs(words, embedded_pos, params)
    return biaffine_heads_pallas(x_bert, x_pos, mask_f, kp, dims)


def _reference_forward(x_bert, x_pos, mask_f, params):
    """Pure-JAX f32 reference (HIGHEST precision) on the same bf16-cast inputs."""
    hp = jax.lax.Precision.HIGHEST
    q = lambda a: a.astype(jnp.bfloat16).astype(jnp.float32)  # match kernel weights
    x = jnp.concatenate(
        [x_bert.astype(jnp.float32), x_pos.astype(jnp.float32)], axis=-1)

    def mlp(w, b):
        h = jnp.einsum("bse,eo->bso", x, q(w), precision=hp) + b
        return jnp.where(h > 0, h, LEAKY_SLOPE * h)

    def aug(t):  # Biaffine bias-ones column
        return jnp.concatenate([t, jnp.ones(t.shape[:-1] + (1,), t.dtype)], -1)

    arc_d = aug(mlp(params["w_arc_d"], params["b_arc_d"]))
    arc_h = mlp(params["w_arc_h"], params["b_arc_h"])
    rel_d = aug(mlp(params["w_rel_d"], params["b_rel_d"]))
    rel_h = aug(mlp(params["w_rel_h"], params["b_rel_h"]))

    s_arc = jnp.einsum("bxi,ij,byj->bxy", arc_d, q(params["w_arc_attn"]), arc_h,
                       precision=hp)
    s_arc = jnp.where(mask_f[:, None, :] > 0.5, s_arc, -jnp.inf)
    s_rel = jnp.einsum("bxi,oij,byj->boxy", rel_d, q(params["w_rel_attn"]), rel_h,
                       precision=hp)
    return s_arc, jnp.transpose(s_rel, (0, 2, 3, 1))


# ---------------------------------- main ---------------------------------------


if __name__ == "__main__":
    B, S = 2, 8
    n_words, n_feats, n_rels = 100, 50, 4
    d_bert, n_feats_pos = 24, 8        # encoder_n_out = 24 + 8 = 32
    n_mlp_arc, n_mlp_rel = 32, 16
    fix_len = 4
    pad_index = 0

    key = jax.random.PRNGKey(0)
    k_words, k_feats, k_pos, k_params = jax.random.split(key, 4)

    words = jax.random.randint(k_words, (B, S), 1, n_words, dtype=jnp.int32)
    words = words.at[1, 6:].set(pad_index)       # padding to exercise the mask
    feats = jax.random.randint(k_feats, (B, S, fix_len), 1, n_feats, dtype=jnp.int32)
    embedded_pos = jax.random.normal(k_pos, (B, S, n_feats_pos), dtype=jnp.float32)

    params = init_params(
        k_params, n_words=n_words, d_bert=d_bert, n_feats_pos=n_feats_pos,
        n_mlp_arc=n_mlp_arc, n_mlp_rel=n_mlp_rel, n_rels=n_rels)
    kp, dims = pack_params(params, d_bert=d_bert)

    s_arc, s_rel = biaffine_dependency_forward(
        words, feats, embedded_pos, params, kp, dims, pad_index)
    s_arc, s_rel = jax.block_until_ready((s_arc, s_rel))

    assert s_arc.shape == (B, S, S), s_arc.shape
    assert s_rel.shape == (B, S, S, n_rels), s_rel.shape

    # Validate against a pure-JAX reference on identical bf16-quantized inputs.
    x_bert, x_pos = _encode_inputs(words, embedded_pos, params)
    mask_f = (words != pad_index).astype(jnp.float32)
    r_arc, r_rel = _reference_forward(x_bert, x_pos, mask_f, params)
    np.testing.assert_allclose(np.asarray(s_arc), np.asarray(r_arc), rtol=2e-2, atol=2e-2)
    np.testing.assert_allclose(np.asarray(s_rel), np.asarray(r_rel), rtol=2e-2, atol=2e-2)

    print("KERNEL_OK")
</pallas_src>

<mosaic_0001>
module attributes {stable_mosaic.version = 11 : i64} {
  func.func @_head_precompute_kernel(%arg0: i32, %arg1: memref<8x24xbf16, #tpu.memory_space<vmem>>, %arg2: memref<8x8xbf16, #tpu.memory_space<vmem>>, %arg3: memref<24x256xbf16, #tpu.memory_space<vmem>>, %arg4: memref<8x256xbf16, #tpu.memory_space<vmem>>, %arg5: memref<1x256xf32, #tpu.memory_space<vmem>>, %arg6: memref<128x512xbf16, #tpu.memory_space<vmem>>, %arg7: memref<8x128xbf16, #tpu.memory_space<vmem>>, %arg8: memref<8x512xbf16, #tpu.memory_space<vmem>>) attributes {dimension_semantics = [#tpu.dimension_semantics<parallel>], iteration_bounds = array<i64: 2>, scalar_prefetch = 0 : i64, scratch_operands = 0 : i64, tpu.core_type = #tpu.core_type<tc>, window_params = [{transform_indices = @transform_0, window_bounds = array<i64: 8, 24>}, {transform_indices = @transform_1, window_bounds = array<i64: 8, 8>}, {pipeline_mode = #tpu.pipeline_mode<synchronous>, transform_indices = @transform_2, window_bounds = array<i64: 24, 256>}, {pipeline_mode = #tpu.pipeline_mode<synchronous>, transform_indices = @transform_3, window_bounds = array<i64: 8, 256>}, {pipeline_mode = #tpu.pipeline_mode<synchronous>, transform_indices = @transform_4, window_bounds = array<i64: 1, 256>}, {pipeline_mode = #tpu.pipeline_mode<synchronous>, transform_indices = @transform_5, window_bounds = array<i64: 128, 512>}, {transform_indices = @transform_6, window_bounds = array<i64: 8, 128>}, {transform_indices = @transform_7, window_bounds = array<i64: 8, 512>}]} {
    %c0 = arith.constant 0 : index
    %c0_0 = arith.constant 0 : index
    %0 = vector.load %arg1[%c0, %c0_0] : memref<8x24xbf16, #tpu.memory_space<vmem>>, vector<8x24xbf16>
    %c0_1 = arith.constant 0 : index
    %c0_2 = arith.constant 0 : index
    %1 = vector.load %arg3[%c0_1, %c0_2] : memref<24x256xbf16, #tpu.memory_space<vmem>>, vector<24x256xbf16>
    %cst = arith.constant dense<0.000000e+00> : vector<8x256xf32>
    %2 = tpu.matmul %0, %1, %cst {dimension_numbers = #tpu.dot_dimension_numbers<[1], [0], [0], [1], [0, 0, 1, 1], [], []>} : vector<8x24xbf16>, vector<24x256xbf16>, vector<8x256xf32> -> vector<8x256xf32>
    %c0_3 = arith.constant 0 : index
    %c0_4 = arith.constant 0 : index
    %3 = vector.load %arg2[%c0_3, %c0_4] : memref<8x8xbf16, #tpu.memory_space<vmem>>, vector<8x8xbf16>
    %c0_5 = arith.constant 0 : index
    %c0_6 = arith.constant 0 : index
    %4 = vector.load %arg4[%c0_5, %c0_6] : memref<8x256xbf16, #tpu.memory_space<vmem>>, vector<8x256xbf16>
    %cst_7 = arith.constant dense<0.000000e+00> : vector<8x256xf32>
    %5 = tpu.matmul %3, %4, %cst_7 {dimension_numbers = #tpu.dot_dimension_numbers<[1], [0], [0], [1], [0, 0, 1, 1], [], []>} : vector<8x8xbf16>, vector<8x256xbf16>, vector<8x256xf32> -> vector<8x256xf32>
    %6 = arith.addf %2, %5 : vector<8x256xf32>
    %c0_8 = arith.constant 0 : index
    %c0_9 = arith.constant 0 : index
    %7 = vector.load %arg5[%c0_8, %c0_9] : memref<1x256xf32, #tpu.memory_space<vmem>>, vector<1x256xf32>
    %8 = vector.broadcast %7 : vector<1x256xf32> to vector<8x256xf32>
    %9 = arith.addf %6, %8 : vector<8x256xf32>
    %cst_10 = arith.constant 0.000000e+00 : f32
    %10 = vector.broadcast %cst_10 : f32 to vector<8x256xf32>
    %11 = arith.cmpf ogt, %9, %10 : vector<8x256xf32>
    %cst_11 = arith.constant 1.000000e-01 : f32
    %12 = vector.broadcast %cst_11 : f32 to vector<8x256xf32>
    %13 = arith.mulf %12, %9 : vector<8x256xf32>
    %14 = arith.select %11, %9, %13 : vector<8x256xi1>, vector<8x256xf32>
    %15 = vector.extract_strided_slice %14 {offsets = [0, 0], sizes = [8, 128], strides = [1, 1]} : vector<8x256xf32> to vector<8x128xf32>
    %16 = arith.truncf %15 : vector<8x128xf32> to vector<8x128xbf16>
    %c0_12 = arith.constant 0 : index
    %c0_13 = arith.constant 0 : index
    %17 = vector.load %arg7[%c0_12, %c0_13] : memref<8x128xbf16, #tpu.memory_space<vmem>>, vector<8x128xbf16>
    tpu.vector_store %arg7[%c0_12, %c0_13], %16 {strides = array<i32>} : memref<8x128xbf16, #tpu.memory_space<vmem>>, vector<8x128xbf16>,
    %18 = vector.extract_strided_slice %14 {offsets = [0, 128], sizes = [8, 128], strides = [1, 1]} : vector<8x256xf32> to vector<8x128xf32>
    %19 = arith.truncf %18 : vector<8x128xf32> to vector<8x128xbf16>
    %c0_14 = arith.constant 0 : index
    %c0_15 = arith.constant 0 : index
    %20 = vector.load %arg6[%c0_14, %c0_15] : memref<128x512xbf16, #tpu.memory_space<vmem>>, vector<128x512xbf16>
    %cst_16 = arith.constant dense<0.000000e+00> : vector<8x512xf32>
    %21 = tpu.matmul %19, %20, %cst_16 {dimension_numbers = #tpu.dot_dimension_numbers<[1], [0], [0], [1], [0, 0, 1, 1], [], []>} : vector<8x128xbf16>, vector<128x512xbf16>, vector<8x512xf32> -> vector<8x512xf32>
    %22 = arith.truncf %21 : vector<8x512xf32> to vector<8x512xbf16>
    %c0_17 = arith.constant 0 : index
    %c0_18 = arith.constant 0 : index
    %23 = vector.load %arg8[%c0_17, %c0_18] : memref<8x512xbf16, #tpu.memory_space<vmem>>, vector<8x512xbf16>
    tpu.vector_store %arg8[%c0_17, %c0_18], %22 {strides = array<i32>} : memref<8x512xbf16, #tpu.memory_space<vmem>>, vector<8x512xbf16>,
    return
  }
  func.func @transform_0(%arg0: i32) -> (i32, i32) {
    %c0_i32 = arith.constant 0 : i32
    %c0_i32_0 = arith.constant 0 : i32
    return %arg0, %c0_i32 : i32, i32
  }
  func.func @transform_1(%arg0: i32) -> (i32, i32) {
    %c0_i32 = arith.constant 0 : i32
    %c0_i32_0 = arith.constant 0 : i32
    return %arg0, %c0_i32 : i32, i32
  }
  func.func @transform_2(%arg0: i32) -> (i32, i32) {
    %c0_i32 = arith.constant 0 : i32
    %c0_i32_0 = arith.constant 0 : i32
    %c0_i32_1 = arith.constant 0 : i32
    return %c0_i32, %c0_i32_0 : i32, i32
  }
  func.func @transform_3(%arg0: i32) -> (i32, i32) {
    %c0_i32 = arith.constant 0 : i32
    %c0_i32_0 = arith.constant 0 : i32
    %c0_i32_1 = arith.constant 0 : i32
    return %c0_i32, %c0_i32_0 : i32, i32
  }
  func.func @transform_4(%arg0: i32) -> (i32, i32) {
    %c0_i32 = arith.constant 0 : i32
    %c0_i32_0 = arith.constant 0 : i32
    %c0_i32_1 = arith.constant 0 : i32
    return %c0_i32, %c0_i32_0 : i32, i32
  }
  func.func @transform_5(%arg0: i32) -> (i32, i32) {
    %c0_i32 = arith.constant 0 : i32
    %c0_i32_0 = arith.constant 0 : i32
    %c0_i32_1 = arith.constant 0 : i32
    return %c0_i32, %c0_i32_0 : i32, i32
  }
  func.func @transform_6(%arg0: i32) -> (i32, i32) {
    %c0_i32 = arith.constant 0 : i32
    %c0_i32_0 = arith.constant 0 : i32
    return %arg0, %c0_i32 : i32, i32
  }
  func.func @transform_7(%arg0: i32) -> (i32, i32) {
    %c0_i32 = arith.constant 0 : i32
    %c0_i32_0 = arith.constant 0 : i32
    return %arg0, %c0_i32 : i32, i32
  }
}

module attributes {stable_mosaic.version = 11 : i64} {
  func.func @_head_precompute_kernel(%arg0: i32, %arg1: memref<8x24xbf16, #tpu.memory_space<vmem>>, %arg2: memref<8x8xbf16, #tpu.memory_space<vmem>>, %arg3: memref<24x256xbf16, #tpu.memory_space<vmem>>, %arg4: memref<8x256xbf16, #tpu.memory_space<vmem>>, %arg5: memref<1x256xf32, #tpu.memory_space<vmem>>, %arg6: memref<128x512xbf16, #tpu.memory_space<vmem>>, %arg7: memref<8x128xbf16, #tpu.memory_space<vmem>>, %arg8: memref<8x512xbf16, #tpu.memory_space<vmem>>) attributes {dimension_semantics = [#tpu.dimension_semantics<parallel>], iteration_bounds = array<i64: 2>, scalar_prefetch = 0 : i64, scratch_operands = 0 : i64, tpu.core_type = #tpu.core_type<tc>, window_params = [{transform_indices = @transform_0, window_bounds = array<i64: 8, 24>}, {transform_indices = @transform_1, window_bounds = array<i64: 8, 8>}, {pipeline_mode = #tpu.pipeline_mode<synchronous>, transform_indices = @transform_2, window_bounds = array<i64: 24, 256>}, {pipeline_mode = #tpu.pipeline_mode<synchronous>, transform_indices = @transform_3, window_bounds = array<i64: 8, 256>}, {pipeline_mode = #tpu.pipeline_mode<synchronous>, transform_indices = @transform_4, window_bounds = array<i64: 1, 256>}, {pipeline_mode = #tpu.pipeline_mode<synchronous>, transform_indices = @transform_5, window_bounds = array<i64: 128, 512>}, {transform_indices = @transform_6, window_bounds = array<i64: 8, 128>}, {transform_indices = @transform_7, window_bounds = array<i64: 8, 512>}]} {
    %c0 = arith.constant 0 : index
    %c0_0 = arith.constant 0 : index
    %0 = vector.load %arg1[%c0, %c0_0] : memref<8x24xbf16, #tpu.memory_space<vmem>>, vector<8x24xbf16>
    %c0_1 = arith.constant 0 : index
    %c0_2 = arith.constant 0 : index
    %1 = vector.load %arg3[%c0_1, %c0_2] : memref<24x256xbf16, #tpu.memory_space<vmem>>, vector<24x256xbf16>
    %cst = arith.constant dense<0.000000e+00> : vector<8x256xf32>
    %2 = tpu.matmul %0, %1, %cst {dimension_numbers = #tpu.dot_dimension_numbers<[1], [0], [0], [1], [0, 0, 1, 1], [], []>} : vector<8x24xbf16>, vector<24x256xbf16>, vector<8x256xf32> -> vector<8x256xf32>
    %c0_3 = arith.constant 0 : index
    %c0_4 = arith.constant 0 : index
    %3 = vector.load %arg2[%c0_3, %c0_4] : memref<8x8xbf16, #tpu.memory_space<vmem>>, vector<8x8xbf16>
    %c0_5 = arith.constant 0 : index
    %c0_6 = arith.constant 0 : index
    %4 = vector.load %arg4[%c0_5, %c0_6] : memref<8x256xbf16, #tpu.memory_space<vmem>>, vector<8x256xbf16>
    %cst_7 = arith.constant dense<0.000000e+00> : vector<8x256xf32>
    %5 = tpu.matmul %3, %4, %cst_7 {dimension_numbers = #tpu.dot_dimension_numbers<[1], [0], [0], [1], [0, 0, 1, 1], [], []>} : vector<8x8xbf16>, vector<8x256xbf16>, vector<8x256xf32> -> vector<8x256xf32>
    %6 = arith.addf %2, %5 : vector<8x256xf32>
    %c0_8 = arith.constant 0 : index
    %c0_9 = arith.constant 0 : index
    %7 = vector.load %arg5[%c0_8, %c0_9] : memref<1x256xf32, #tpu.memory_space<vmem>>, vector<1x256xf32>
    %8 = vector.broadcast %7 : vector<1x256xf32> to vector<8x256xf32>
    %9 = arith.addf %6, %8 : vector<8x256xf32>
    %cst_10 = arith.constant 0.000000e+00 : f32
    %10 = vector.broadcast %cst_10 : f32 to vector<8x256xf32>
    %11 = arith.cmpf ogt, %9, %10 : vector<8x256xf32>
    %cst_11 = arith.constant 1.000000e-01 : f32
    %12 = vector.broadcast %cst_11 : f32 to vector<8x256xf32>
    %13 = arith.mulf %12, %9 : vector<8x256xf32>
    %14 = arith.select %11, %9, %13 : vector<8x256xi1>, vector<8x256xf32>
    %15 = vector.extract_strided_slice %14 {offsets = [0, 0], sizes = [8, 128], strides = [1, 1]} : vector<8x256xf32> to vector<8x128xf32>
    %16 = arith.truncf %15 : vector<8x128xf32> to vector<8x128xbf16>
    %c0_12 = arith.constant 0 : index
    %c0_13 = arith.constant 0 : index
    %17 = vector.load %arg7[%c0_12, %c0_13] : memref<8x128xbf16, #tpu.memory_space<vmem>>, vector<8x128xbf16>
    tpu.vector_store %arg7[%c0_12, %c0_13], %16 {strides = array<i32>} : memref<8x128xbf16, #tpu.memory_space<vmem>>, vector<8x128xbf16>,
    %18 = vector.extract_strided_slice %14 {offsets = [0, 128], sizes = [8, 128], strides = [1, 1]} : vector<8x256xf32> to vector<8x128xf32>
    %19 = arith.truncf %18 : vector<8x128xf32> to vector<8x128xbf16>
    %c0_14 = arith.constant 0 : index
    %c0_15 = arith.constant 0 : index
    %20 = vector.load %arg6[%c0_14, %c0_15] : memref<128x512xbf16, #tpu.memory_space<vmem>>, vector<128x512xbf16>
    %cst_16 = arith.constant dense<0.000000e+00> : vector<8x512xf32>
    %21 = tpu.matmul %19, %20, %cst_16 {dimension_numbers = #tpu.dot_dimension_numbers<[1], [0], [0], [1], [0, 0, 1, 1], [], []>} : vector<8x128xbf16>, vector<128x512xbf16>, vector<8x512xf32> -> vector<8x512xf32>
    %22 = arith.truncf %21 : vector<8x512xf32> to vector<8x512xbf16>
    %c0_17 = arith.constant 0 : index
    %c0_18 = arith.constant 0 : index
    %23 = vector.load %arg8[%c0_17, %c0_18] : memref<8x512xbf16, #tpu.memory_space<vmem>>, vector<8x512xbf16>
    tpu.vector_store %arg8[%c0_17, %c0_18], %22 {strides = array<i32>} : memref<8x512xbf16, #tpu.memory_space<vmem>>, vector<8x512xbf16>,
    return
  }
  func.func @transform_0(%arg0: i32) -> (i32, i32) {
    %c0_i32 = arith.constant 0 : i32
    %c0_i32_0 = arith.constant 0 : i32
    return %arg0, %c0_i32 : i32, i32
  }
  func.func @transform_1(%arg0: i32) -> (i32, i32) {
    %c0_i32 = arith.constant 0 : i32
    %c0_i32_0 = arith.constant 0 : i32
    return %arg0, %c0_i32 : i32, i32
  }
  func.func @transform_2(%arg0: i32) -> (i32, i32) {
    %c0_i32 = arith.constant 0 : i32
    %c0_i32_0 = arith.constant 0 : i32
    %c0_i32_1 = arith.constant 0 : i32
    return %c0_i32, %c0_i32_0 : i32, i32
  }
  func.func @transform_3(%arg0: i32) -> (i32, i32) {
    %c0_i32 = arith.constant 0 : i32
    %c0_i32_0 = arith.constant 0 : i32
    %c0_i32_1 = arith.constant 0 : i32
    return %c0_i32, %c0_i32_0 : i32, i32
  }
  func.func @transform_4(%arg0: i32) -> (i32, i32) {
    %c0_i32 = arith.constant 0 : i32
    %c0_i32_0 = arith.constant 0 : i32
    %c0_i32_1 = arith.constant 0 : i32
    return %c0_i32, %c0_i32_0 : i32, i32
  }
  func.func @transform_5(%arg0: i32) -> (i32, i32) {
    %c0_i32 = arith.constant 0 : i32
    %c0_i32_0 = arith.constant 0 : i32
    %c0_i32_1 = arith.constant 0 : i32
    return %c0_i32, %c0_i32_0 : i32, i32
  }
  func.func @transform_6(%arg0: i32) -> (i32, i32) {
    %c0_i32 = arith.constant 0 : i32
    %c0_i32_0 = arith.constant 0 : i32
    return %arg0, %c0_i32 : i32, i32
  }
  func.func @transform_7(%arg0: i32) -> (i32, i32) {
    %c0_i32 = arith.constant 0 : i32
    %c0_i32_0 = arith.constant 0 : i32
    return %arg0, %c0_i32 : i32, i32
  }
}

</mosaic_0001>

<bundles_post_ra>
// kernel: tpu_custom_call.1
= control target key start
LH: loop header
LB: loop body
LE: loop exit
PB: predicated region body
PF: predicated region fallthrough
CT: control target
= control target key end

     0   :  { %s1566_s0 = inlined_call_operand.vmem [shape: bf16[16,24], index: 0, kind: input, shape index: {}]   ;;  %s1567_s1 = inlined_call_operand.vmem [shape: bf16[16,8], index: 1, kind: input, shape index: {}]   ;;  %s1568_s2 = inlined_call_operand.hbm [shape: bf16[24,256], index: 2, kind: input, shape index: {}]   ;;  %s1569_s3 = inlined_call_operand.hbm [shape: bf16[8,256], index: 3, kind: input, shape index: {}]   ;;  %s1570_s4 = inlined_call_operand.vmem [shape: f32[1,256], index: 4, kind: input, shape index: {}]   ;;  %s1571_s5 = inlined_call_operand.hbm [shape: bf16[128,512], index: 5, kind: input, shape index: {}]   ;;  %s1572_s6 = inlined_call_operand.hbm [shape: bf16[16,128], index: 6, kind: output, shape index: {0}]   ;;  %s1573_s7 = inlined_call_operand.hbm [shape: bf16[16,512], index: 7, kind: output, shape index: {1}]  }
   0x1   :  { %1574 = sst [smem:[#allocation15_spill]] %s1568_s2 }
   0x2   :  { %1575 = sst [smem:[#allocation16_spill]] %s1569_s3 }
   0x3   :  { %13 = vsyncpa [#allocation3], 0 }
   0x4   :  { %14 = vsyncpa [#allocation6], 0 }
   0x5   :  { %15 = vsyncpa [#allocation4], 0 }
   0x6   :  { %17 = vsyncpa [#allocation4 + $0x1], 0 }
   0x7   :  { %18 = vsyncpa [#allocation10], 0 }
   0x8   :  { %20 = vsyncpa [#allocation10 + $0x1], 0  ;;  %s1402_s24 = smov 0   ;;  %s1404_s25 = smov 0  }
   0x9   :  { %s1406_s26 = smov 0   ;;  %s1408_s27 = smov 0  }
   0xa LB: > { %s1423_s28 = sadd.s32 4294967295, %s1353_s27   ;;  %s886_s29 = sadd.s32 4294967294, %s1353_s27   ;;  %s1353_s27 = sphi %s1408_s27, %s1585_s27   ;;  %s1349_s26 = sphi %s1406_s26, %s1584_s26   ;;  %s1345_s25 = sphi %s1404_s25, %s1583_s25   ;;  %s1341_s24 = sphi %s1402_s24, %s1582_s24  }
   0xb   : > { %s1427_s30 = sadd.s32 1, %s1353_s27   ;;  %s169_s8 = sadd.s32 1, %s1349_s26 }
   0xc   : > { %s166_s9 = ssub.s32 %s1353_s27, %s1427_s30  ;;  %p179_p0 = scmp.ne.s32.totalorder %s1349_s26, %s1345_s25 }
   0xd   : > { %p167_p1 = scmp.eq.s32.totalorder %s166_s9, 0  ;;  %p180_p2 = scmp.eq.s32.totalorder %s1423_s28, 1 }
   0xe   : > { %p185_p3 = scmp.ne.s32.totalorder %s1345_s25, %s1341_s24  ;;  %p186_p4 = scmp.eq.s32.totalorder %s886_s29, 1 }
   0xf   : > { %s1438_s10 = scalar_select %p167_p1, %s1349_s26, %s169_s8  }
  0x10   : > { %p1440_p5 = por %p180_p2, %p179_p0  ;;  %p1444_p6 = por %p186_p4, %p185_p3 }
  0x11   : > { %p887_p7 = scmp.ge.s32.totalorder %s1353_s27, 1  ;;  %p219_p8 = scmp.lt.s32.totalorder %s1353_s27, 3 }
  0x12   : > { %p1115_p9 = scmp.eq.s32.totalorder %s1423_s28, 0  ;;  %s1579_s3 = sld [smem:[#allocation16_spill]] }
  0x13   : > { %p1451_p10 = pnand %p887_p7, %p219_p8  ;;  %s1355_s17 = smov [#allocation5]  }
  0x14   : > { %s247_s18 = sshll.u32 %s1355_s17, 4  ;;  %s1580_s2 = sld [smem:[#allocation15_spill]]  ;;  %s248_s18 = int_to_ptr.vmem [resolvable:$true] %s247_s18 }
  0x15   : > { %p1098_p11 = pneg %p1451_p10  ;;  %s1356_s23 = smov [#allocation2]  }
  0x16   : > { %s232_s29 = sshll.u32 %s1356_s23, 4  ;;  %s1357_s8 = smov 128   ;;  %s233_s29 = int_to_ptr.vmem [resolvable:$true] %s232_s29 }
  0x17   : > { %p1465_p12 = pnand %p1115_p9, %p1098_p11  ;;  %s1358_s9 = smov 8  }
  0x18   : > { %s245_s16 = sshll.u32 %s1579_s3, 4  ;;  %s259_s17 = sshll.u32 %s1571_s5, 4  ;;  %s246_s16 = int_to_ptr.hbm [resolvable:$true] %s245_s16  ;;  %s260_s17 = int_to_ptr.hbm [resolvable:$true] %s259_s17 }
  0x19   : > { %1104 = dma.hbm_to_vmem [thread:$0]  (!%p1465_p12), %s246_s16, 128, %s248_s18, [#allocation6]  }
  0x1a   : > { %s230_s21 = sshll.u32 %s1580_s2, 4  ;;  %s1359_s19 = smov [#allocation7]   ;;  %s231_s21 = int_to_ptr.hbm [resolvable:$true] %s230_s21 }
  0x1b   : > { %1101 = dma.hbm_to_vmem [thread:$0]  (!%p1465_p12), %s231_s21, 384, %s233_s29, [#allocation3], %s1357_s8, %s1357_s8, %s1358_s9  }
  0x1c   : > { %s261_s20 = sshll.u32 %s1359_s19, 4  ;;  %s1360_s2 = smov 256   ;;  %s262_s20 = int_to_ptr.vmem [resolvable:$true] %s261_s20 }
  0x1d   : > { %s1361_s3 = smov 16   ;;  %291 = sbr.rel (%p1451_p10) target bundleno = 332 (0x14c), region = 44 }
  0x1e   : > { %1107 = dma.hbm_to_vmem [thread:$0]  (!%p1465_p12), %s260_s17, 4096, %s262_s20, [#allocation6], %s1360_s2, %s1360_s2, %s1361_s3  }
  0x22   : > { %1324 = dma.done.wait (%p1115_p9), [#allocation3], 384  }
  0x23   : > { %1326 = vsyncadd (%p1115_p9), [#allocation3], 4294966912 }
  0x24   : > { %1328 = dma.done.wait (%p1115_p9), [#allocation6], 4224  }
  0x25   : > { %1330 = vsyncadd (%p1115_p9), [#allocation6], 4294963072  ;;  %p342_p13 = scmp.lt.s32.totalorder %s1423_s28, 1  ;;  %v354_v0 = vld [vmem:[#allocation2 + $0x10] sm:$0xff]  ;;  %vm366_vm0 = vcmask 1043456   ;;  %v356_v1 = vld [vmem:[#allocation5] sm:$0xff] }
  0x26   : > { %vm362_vm1 = vcmask 64512   ;;  %v407_v2 = vunpack.c.h.b16 %v354_v0  ;;  %v359_v3 = vunpack.c.h.b16 %v356_v1  ;;  %v1047_v4 = vld [vmem:[#allocation2 + $0x4] sm:$0xf]  ;;  %v906_v5 = vld [vmem:[#allocation2 + $0x8] sm:$0xf0]  ;;  %v406_v6 = vunpack.c.l.b16 %v354_v0  ;;  %s1515_s9 = sand.u32 1, %s1345_s25  }
  0x27   : > { %s1490_s16 = scalar_select %p342_p13, %s1423_s28, 1  ;;  %v358_v7 = vunpack.c.l.b16 %v356_v1  ;;  %v904_v8 = vld [vmem:[#allocation2] sm:$0xf]  ;;  %v1048_v9 = vld [vmem:[#allocation2 + $0x4] sm:$0xf0]  ;;  %v909_v29 = vor.u32 %v1047_v4, %v906_v5  ;;  %vm414_vm2 = vcmask 195584  }
  0x28   : > { %v1026_v10 = vld [vmem:[#allocation7 + $0xe0] sm:$0xf]  ;;  %v411_v11 = vpack.c.b16 %v407_v2, %v407_v2  ;;  %v361_v12 = vpack.c.b16 %v359_v3, %v359_v3  ;;  %v410_v13 = vpack.c.b16 %v406_v6, %v406_v6  ;;  %v1079_v15 = vld [vmem:[#allocation7 + $0xec] sm:$0xf0]  ;;  %v1077_v16 = vld [vmem:[#allocation7 + $0xe4] sm:$0xf]  ;;  %v905_v33 = vor.u32 %v1048_v9, %v904_v8 }
  0x29   : > { %s898_s2 = sshll.u32 %s1490_s16, 2  ;;  %v360_v14 = vpack.c.b16 %v358_v7, %v358_v7  ;;  %v1028_v17 = vld [vmem:[#allocation7 + $0xf0] sm:$0xf0]  ;;  %v1027_v19 = vor.u32 %v1079_v15, %v1026_v10  ;;  %v1034_v21 = vld [vmem:[#allocation7 + $0xe8] sm:$0xf]  ;;  %s896_s14 = sshll.u32 %s1515_s9, 2 }
  0x2a   : > { %s349_s18 = scalar_lea.vmem %s1567_s1, %s898_s2  ;;  %v1031_v20 = vor.u32 %v1077_v16, %v1028_v17  ;;  %v1080_v22 = vld [vmem:[#allocation7 + $0xf4] sm:$0xf0]  ;;  %v1078_v23 = vld [vmem:[#allocation7 + $0xec] sm:$0xf]  ;;  %v422_v24 = vsel %vm366_vm0, %v411_v11, 0  ;;  %v371_v25 = vsel %vm366_vm0, %v361_v12, 0  ;;  %s345_s23 = scalar_lea.vmem %s1566_s0, %s898_s2 }
  0x2b   : > { %v355_v18 = vld [vmem:[%s349_s18] sm:$0xf]  ;;  %v419_v26 = vsel %vm366_vm0, %v410_v13, 0  ;;  %v368_v27 = vsel %vm366_vm0, %v360_v14, 0  ;;  %v1036_v28 = vld [vmem:[#allocation7 + $0xf8] sm:$0xf0]  ;;  %443 = vmatpush.bf16.msra.mxu3 %v422_v24  ;;  %393 = vmatpush.bf16.msra.mxu1 %v371_v25  ;;  %v1035_v36 = vor.u32 %v1080_v22, %v1034_v21 }
  0x2c   : > { %v1010_v30 = vld [vmem:[#allocation7 + $0xc0] sm:$0xf]  ;;  %v1075_v31 = vld [vmem:[#allocation7 + $0xcc] sm:$0xf0]  ;;  %v1073_v32 = vld [vmem:[#allocation7 + $0xc4] sm:$0xf]  ;;  %430 = vmatpush.bf16.msra.mxu2 %v419_v26  ;;  %380 = vmatpush.bf16.msra.mxu0 %v368_v27  ;;  %v1039_v34 = vor.u32 %v1078_v23, %v1036_v28 }
  0x2d   : > { %v1012_v35 = vld [vmem:[#allocation7 + $0xd0] sm:$0xf0]  ;;  %v1011_v37 = vor.u32 %v1075_v31, %v1010_v30  ;;  %v1018_v38 = vld [vmem:[#allocation7 + $0xc8] sm:$0xf]  ;;  %v1074_v39 = vld [vmem:[#allocation7 + $0xcc] sm:$0xf] }
  0x2e   : > { %v1020_v40 = vld [vmem:[#allocation7 + $0xd8] sm:$0xf0]  ;;  %901 = vmatmul.msk.bf16.vlgmr.msra.gmra.mxu1 %vm362_vm1, %v355_v18  ;;  %v1015_v41 = vor.u32 %v1073_v32, %v1012_v35  ;;  %v1076_v42 = vld [vmem:[#allocation7 + $0xd4] sm:$0xf0]  ;;  %v994_v43 = vld [vmem:[#allocation7 + $0xa0] sm:$0xf] }
  0x2f   : > { %672 = vmatpush.bf16.msrb.mxu1 %v1031_v20  ;;  %v1071_v44 = vld [vmem:[#allocation7 + $0xac] sm:$0xf0]  ;;  %444 = vmatpush.bf16.msra.mxu3 %v909_v29  ;;  %v351_v45 = vld [vmem:[%s345_s23] sm:$0xf]  ;;  %v1069_v46 = vld [vmem:[#allocation7 + $0xa4] sm:$0xf]  ;;  %v1023_v48 = vor.u32 %v1074_v39, %v1020_v40  ;;  %v1019_v49 = vor.u32 %v1076_v42, %v1018_v38 }
  0x30   : > { %659 = vmatpush.bf16.msrb.mxu0 %v1027_v19  ;;  %v996_v47 = vld [vmem:[#allocation7 + $0xb0] sm:$0xf0]  ;;  %431 = vmatpush.bf16.msra.mxu2 %v905_v33  ;;  %v995_v50 = vor.u32 %v1071_v44, %v994_v43  ;;  %v1002_v51 = vld [vmem:[#allocation7 + $0xa8] sm:$0xf]  ;;  %v1070_v52 = vld [vmem:[#allocation7 + $0xac] sm:$0xf] }
  0x31   : > { %900 = vmatmul.msk.bf16.vlgmr.msra.gmra.mxu0 %vm362_vm1, %v355_v18  ;;  %v1004_v53 = vld [vmem:[#allocation7 + $0xb8] sm:$0xf0]  ;;  %v999_v54 = vor.u32 %v1069_v46, %v996_v47  ;;  %v1072_v55 = vld [vmem:[#allocation7 + $0xb4] sm:$0xf0]  ;;  %v978_v56 = vld [vmem:[#allocation7 + $0x80] sm:$0xf] }
  0x32   : > { %911 = vmatmul.msk.bf16.vlgmr.msra.gmra.mxu3 %vm414_vm2, %v351_v45  ;;  %v1067_v57 = vld [vmem:[#allocation7 + $0x8c] sm:$0xf0]  ;;  %v1065_v58 = vld [vmem:[#allocation7 + $0x84] sm:$0xf]  ;;  %v980_v59 = vld [vmem:[#allocation7 + $0x90] sm:$0xf0]  ;;  %v1007_v60 = vor.u32 %v1070_v52, %v1004_v53  ;;  %v1003_v61 = vor.u32 %v1072_v55, %v1002_v51 }
  0x33   : > { %698 = vmatpush.bf16.msrb.mxu3 %v1039_v34  ;;  %673 = vmatpush.bf16.msrb.mxu1 %v1015_v41  ;;  %v979_v62 = vor.u32 %v1067_v57, %v978_v56  ;;  %v1066_v63 = vld [vmem:[#allocation7 + $0x8c] sm:$0xf]  ;;  %v988_v0 = vld [vmem:[#allocation7 + $0x98] sm:$0xf0]  ;;  %v983_v1 = vor.u32 %v1065_v58, %v980_v59  ;;  %v986_v2 = vld [vmem:[#allocation7 + $0x88] sm:$0xf] }
  0x34   : > { %685 = vmatpush.bf16.msrb.mxu2 %v1035_v36  ;;  %660 = vmatpush.bf16.msrb.mxu0 %v1011_v37  ;;  %v1068_v3 = vld [vmem:[#allocation7 + $0x94] sm:$0xf0]  ;;  %v991_v4 = vor.u32 %v1066_v63, %v988_v0  ;;  %v962_v6 = vld [vmem:[#allocation7 + $0x60] sm:$0xf]  ;;  %v1063_v7 = vld [vmem:[#allocation7 + $0x6c] sm:$0xf0] }
  0x35   : > { %910 = vmatmul.msk.bf16.vlgmr.msra.gmra.mxu2 %vm414_vm2, %v351_v45  ;;  %v987_v5 = vor.u32 %v1068_v3, %v986_v2  ;;  %v1061_v8 = vld [vmem:[#allocation7 + $0x64] sm:$0xf]  ;;  %v963_v9 = vor.u32 %v1063_v7, %v962_v6  ;;  %v964_v10 = vld [vmem:[#allocation7 + $0x70] sm:$0xf0]  ;;  %v970_v11 = vld [vmem:[#allocation7 + $0x68] sm:$0xf] }
  0x36   : > { %v1064_v12 = vld [vmem:[#allocation7 + $0x74] sm:$0xf0]  ;;  %v967_v13 = vor.u32 %v1061_v8, %v964_v10  ;;  %v1062_v15 = vld [vmem:[#allocation7 + $0x6c] sm:$0xf]  ;;  %v972_v16 = vld [vmem:[#allocation7 + $0x78] sm:$0xf0] }
  0x37   : > { %699 = vmatpush.bf16.msrb.mxu3 %v1023_v48  ;;  %674 = vmatpush.bf16.msrb.mxu1 %v999_v54  ;;  %v971_v14 = vor.u32 %v1064_v12, %v970_v11  ;;  %v946_v17 = vld [vmem:[#allocation7 + $0x40] sm:$0xf]  ;;  %v975_v18 = vor.u32 %v1062_v15, %v972_v16  ;;  %v1059_v19 = vld [vmem:[#allocation7 + $0x4c] sm:$0xf0]  ;;  %v1057_v20 = vld [vmem:[#allocation7 + $0x44] sm:$0xf] }
  0x38   : > { %686 = vmatpush.bf16.msrb.mxu2 %v1019_v49  ;;  %661 = vmatpush.bf16.msrb.mxu0 %v995_v50  ;;  %v948_v21 = vld [vmem:[#allocation7 + $0x50] sm:$0xf0]  ;;  %v947_v22 = vor.u32 %v1059_v19, %v946_v17  ;;  %v954_v24 = vld [vmem:[#allocation7 + $0x48] sm:$0xf]  ;;  %v1060_v25 = vld [vmem:[#allocation7 + $0x54] sm:$0xf0] }
  0x39   : > { %v951_v23 = vor.u32 %v1057_v20, %v948_v21  ;;  %v1058_v26 = vld [vmem:[#allocation7 + $0x4c] sm:$0xf]  ;;  %v955_v27 = vor.u32 %v1060_v25, %v954_v24  ;;  %v956_v28 = vld [vmem:[#allocation7 + $0x58] sm:$0xf0]  ;;  %v930_v30 = vld [vmem:[#allocation7 + $0x20] sm:$0xf] }
  0x3a   : > { %v959_v29 = vor.u32 %v1058_v26, %v956_v28  ;;  %v1055_v31 = vld [vmem:[#allocation7 + $0x2c] sm:$0xf0]  ;;  %v1053_v33 = vld [vmem:[#allocation7 + $0x24] sm:$0xf]  ;;  %v932_v34 = vld [vmem:[#allocation7 + $0x30] sm:$0xf0] }
  0x3b   : > { %700 = vmatpush.bf16.msrb.mxu3 %v1007_v60  ;;  %675 = vmatpush.bf16.msrb.mxu1 %v983_v1  ;;  %v931_v32 = vor.u32 %v1055_v31, %v930_v30  ;;  %v935_v35 = vor.u32 %v1053_v33, %v932_v34  ;;  %v938_v36 = vld [vmem:[#allocation7 + $0x28] sm:$0xf]  ;;  %v1056_v37 = vld [vmem:[#allocation7 + $0x34] sm:$0xf0]  ;;  %v1054_v38 = vld [vmem:[#allocation7 + $0x2c] sm:$0xf] }
  0x3c   : > { %687 = vmatpush.bf16.msrb.mxu2 %v1003_v61  ;;  %662 = vmatpush.bf16.msrb.mxu0 %v979_v62  ;;  %v939_v39 = vor.u32 %v1056_v37, %v938_v36  ;;  %v940_v40 = vld [vmem:[#allocation7 + $0x38] sm:$0xf0]  ;;  %v914_v42 = vld [vmem:[#allocation7] sm:$0xf]  ;;  %v1051_v43 = vld [vmem:[#allocation7 + $0xc] sm:$0xf0] }
  0x3d   : > { %v943_v41 = vor.u32 %v1054_v38, %v940_v40  ;;  %v1049_v44 = vld [vmem:[#allocation7 + $0x4] sm:$0xf]  ;;  %v915_v45 = vor.u32 %v1051_v43, %v914_v42  ;;  %v916_v46 = vld [vmem:[#allocation7 + $0x10] sm:$0xf0]  ;;  %v922_v47 = vld [vmem:[#allocation7 + $0x8] sm:$0xf] }
  0x3e   : > { %v1052_v48 = vld [vmem:[#allocation7 + $0x14] sm:$0xf0]  ;;  %v919_v49 = vor.u32 %v1049_v44, %v916_v46  ;;  %v1050_v51 = vld [vmem:[#allocation7 + $0xc] sm:$0xf]  ;;  %v924_v52 = vld [vmem:[#allocation7 + $0x18] sm:$0xf0] }
  0x3f   : > { %701 = vmatpush.bf16.msrb.mxu3 %v991_v4  ;;  %676 = vmatpush.bf16.msrb.mxu1 %v967_v13  ;;  %v923_v50 = vor.u32 %v1052_v48, %v922_v47  ;;  %v927_v53 = vor.u32 %v1050_v51, %v924_v52  ;;  %v450_v56 = vld [vmem:[%s1570_s4] sm:$0x3]  ;;  %s334_s15 = scalar_lea.vmem [#allocation8], %s896_s14  ;;  %s1042_s17 = sshll.u32 %s1423_s28, 2 }
  0x40   : > { %688 = vmatpush.bf16.msrb.mxu2 %v987_v5  ;;  %663 = vmatpush.bf16.msrb.mxu0 %v963_v9  ;;  %v453_v58 = vperm.slane %v450_v56, 1  ;;  %v452_v61 = vperm.slane %v450_v56, 0  ;;  %s731_s16 = scalar_lea.hbm %s1572_s6, %s1042_s17  ;;  %s733_s2 = sshll.u32 %s334_s15, 4  ;;  %s734_s2 = int_to_ptr.vmem [resolvable:$true] %s733_s2 }
  0x41   : > { %s735_s3 = sshll.u32 %s731_s16, 4  ;;  %s716_s13 = scalar_lea.sflag [#allocation4], %s1515_s9  ;;  %s736_s3 = int_to_ptr.hbm [resolvable:$true] %s735_s3 }
  0x42   : > { %s1265_s18 = sshra.s32 %s736_s3, 4  ;;  %s1271_s29 = scalar_lea.hbm %s1572_s6, 8  ;;  %s1266_s18 = int_to_ptr.hbm [resolvable:$true] %s1265_s18 }
  0x43   : > { %702 = vmatpush.bf16.msrb.mxu3 %v975_v18  ;;  %677 = vmatpush.bf16.msrb.mxu1 %v951_v23  ;;  %s1267_s21 = scalar_lea.hbm %s1266_s18, 4  ;;  %p1272_p3 = scmp.lt.s32.totalorder %s1266_s18, %s1572_s6 }
  0x44   : > { %689 = vmatpush.bf16.msrb.mxu2 %v971_v14  ;;  %664 = vmatpush.bf16.msrb.mxu0 %v947_v22  ;;  %p1268_p0 = scmp.ne.s32.totalorder %s1266_s18, %s1267_s21  ;;  %p1273_p4 = scmp.lt.s32.totalorder %s1271_s29, %s1267_s21 }
  0x46   : > { %p1269_p1 = pnand %p1268_p0, %p1440_p5  ;;  %p1274_p7 = por %p1273_p4, %p1272_p3 }
  0x47   : > { %703 = vmatpush.bf16.msrb.mxu3 %v959_v29  ;;  %678 = vmatpush.bf16.msrb.mxu1 %v935_v35 }
  0x48   : > { %690 = vmatpush.bf16.msrb.mxu2 %v955_v27  ;;  %665 = vmatpush.bf16.msrb.mxu0 %v931_v32  ;;  %p1270_p2 = pneg %p1269_p1 }
  0x4a   : > { %p1275_p8 = pnand %p1274_p7, %p1270_p2 }
  0x4b   : > { %704 = vmatpush.bf16.msrb.mxu3 %v943_v41  ;;  %679 = vmatpush.bf16.msrb.mxu1 %v919_v49 }
  0x4c   : > { %691 = vmatpush.bf16.msrb.mxu2 %v939_v39  ;;  %666 = vmatpush.bf16.msrb.mxu0 %v915_v45 }
  0x4f   : > { %705 = vmatpush.bf16.msrb.mxu3 %v927_v53 }
  0x50   : > { %692 = vmatpush.bf16.msrb.mxu2 %v923_v50 }
  0xab   : > { %v395_v54 = vpop.f32.mrf.mxu1 }
  0xae   : > { %v382_v55 = vpop.f32.mrf.mxu0 }
  0xb3   : > { %v397_v57 = vpop.f32.mrf.mxu1 }
  0xb5   : > { %v446_v60 = vpop.f32.mrf.mxu3 }
  0xb6   : > { %v384_v59 = vpop.f32.mrf.mxu0  ;;  %v447_v62 = vadd.f32 %v446_v60, %v395_v54 }
  0xb8   : > { %v433_v63 = vpop.f32.mrf.mxu2  ;;  %v457_v1 = vadd.f32 %v453_v58, %v447_v62 }
  0xb9   : > { %v434_v0 = vadd.f32 %v433_v63, %v382_v55 }
  0xba   : > { %vm459_vm3 = vcmp.gt.f32.partialorder %v457_v1, 0.0  ;;  %v461_v3 = vmul.f32 0.1, %v457_v1 }
  0xbb   : > { %v456_v2 = vadd.f32 %v452_v61, %v434_v0 }
  0xbc   : > { %v463_v5 = vsel %vm459_vm3, %v457_v1, %v461_v3 }
  0xbd   : > { %vm458_vm4 = vcmp.gt.f32.partialorder %v456_v2, 0.0  ;;  %v460_v4 = vmul.f32 0.1, %v456_v2  ;;  %v466_v6 = vpack.c.bf16 %v463_v5, %v463_v5  ;;  %v448_v7 = vpop.f32.mrf.mxu3 }
  0xbf   : > { %v462_v8 = vsel %vm458_vm4, %v456_v2, %v460_v4  ;;  %667 = vmatmul.bf16.vlgmr.msrb.gmra.mxu0 %v466_v6  ;;  %680 = vmatmul.bf16.vlgmr.msrb.gmra.mxu1 %v466_v6 }
  0xc0   : > { %v464_v9 = vpack.c.bf16 %v462_v8, %v462_v8  ;;  %v435_v10 = vpop.f32.mrf.mxu2  ;;  %693 = vmatmul.bf16.vlgmr.msrb.gmra.mxu2 %v466_v6  ;;  %706 = vmatmul.bf16.vlgmr.msrb.gmra.mxu3 %v466_v6 }
  0xc2   : > { %465 = vst [vmem:[%s334_s15] sm:$0xf] %v464_v9 }
  0xc3   : > { %1278 = shalt.err (!%p1275_p8)
}
  0xc4   : > { %1094 = dma.vmem_to_hbm [thread:$0]  (%p1440_p5), %s734_s2, 64, %s736_s3, %s716_s13  }
  0xc5   : > { %s897_s15 = sshll.u32 %s1515_s9, 4  ;;  %s1081_s17 = sshll.u32 %s1423_s28, 4 }
  0xc6   : > { %s746_s16 = scalar_lea.hbm %s1573_s7, %s1081_s17  ;;  %s341_s18 = scalar_lea.vmem [#allocation9], %s897_s15 }
  0xc7   : > { %s748_s21 = sshll.u32 %s341_s18, 4  ;;  %s750_s22 = sshll.u32 %s746_s16, 4  ;;  %s749_s21 = int_to_ptr.vmem [resolvable:$true] %s748_s21  ;;  %s751_s22 = int_to_ptr.hbm [resolvable:$true] %s750_s22 }
  0xc8   : > { %s721_s28 = scalar_lea.sflag [#allocation10], %s1515_s9  ;;  %s1293_s2 = sshra.s32 %s751_s22, 4  ;;  %s1294_s2 = int_to_ptr.hbm [resolvable:$true] %s1293_s2 }
  0xc9   : > { %s1295_s3 = scalar_lea.hbm %s1294_s2, 16  ;;  %s1299_s29 = scalar_lea.hbm %s1573_s7, 32 }
  0xca   : > { %p1296_p9 = scmp.ne.s32.totalorder %s1294_s2, %s1295_s3  ;;  %p1300_p12 = scmp.lt.s32.totalorder %s1294_s2, %s1573_s7 }
  0xcb   : > { %p1301_p13 = scmp.lt.s32.totalorder %s1299_s29, %s1295_s3 }
  0xcc   : > { %p1297_p10 = pnand %p1296_p9, %p1440_p5 }
  0xcd   : > { %p1302_p0 = por %p1301_p13, %p1300_p12 }
  0xce   : > { %p1298_p11 = pneg %p1297_p10 }
  0xd0   : > { %p1303_p1 = pnand %p1302_p0, %p1298_p11 }
 0x13c   : > { %v668_v11 = vpop.f32.mrf.mxu0  ;;  %v681_v12 = vpop.f32.mrf.mxu1 }
 0x13d   : > { %v711_v13 = vpack.c.bf16 %v681_v12, %v668_v11 }
 0x13f   : > { %713 = vst [vmem:[%s341_s18] sm:$0xff] %v711_v13 }
 0x143   : > { %v694_v14 = vpop.f32.mrf.mxu2  ;;  %v707_v15 = vpop.f32.mrf.mxu3 }
 0x144   : > { %v712_v16 = vpack.c.bf16 %v707_v15, %v694_v14  ;;  %v670_v17 = vpop.f32.mrf.mxu0  ;;  %v683_v18 = vpop.f32.mrf.mxu1 }
 0x146   : > { %714 = vst [vmem:[%s341_s18 + $0x8] sm:$0xff] %v712_v16 }
 0x147   : > { %1306 = shalt.err (!%p1303_p1)
}
 0x148   : > { %1095 = dma.vmem_to_hbm [thread:$0]  (%p1440_p5), %s749_s21, 256, %s751_s22, %s721_s28  }
 0x14b   : > { %v696_v19 = vpop.f32.mrf.mxu2  ;;  %v709_v20 = vpop.f32.mrf.mxu3 }
 0x14c PF: > { %p1121_p2 = scmp.ge.s32.totalorder %s1353_s27, 2  ;;  %s762_s9 = sand.u32 1, %s1341_s24  }
 0x14d   : > { %s763_s15 = scalar_lea.sflag [#allocation4], %s762_s9 }
 0x14e   : > { %p1109_p3 = pnand %p1121_p2, %p1444_p6 }
 0x150   : > { %p1110_p4 = pneg %p1109_p3 }
 0x152   : > { %1332 = dma.done.wait (%p1110_p4), %s763_s15, 64  }
 0x153   : > { %1334 = vsyncadd (%p1110_p4), %s763_s15, 4294967232  ;;  %s773_s17 = scalar_lea.sflag [#allocation10], %s762_s9 }
 0x154   : > { %1336 = dma.done.wait (%p1110_p4), %s773_s17, 256  }
 0x155   : > { %1338 = vsyncadd (%p1110_p4), %s773_s17, 4294967040  ;;  %p23_p5 = scmp.ge.s32.totalorder %s1427_s30, 4   ;;  %s1582_s24 = smov %s1345_s25 }
 0x156   : > { %s1583_s25 = smov %s1349_s26  ;;  %s1584_s26 = smov %s1438_s10 }
 0x157   : > { %s1585_s27 = smov %s1427_s30  ;;  %25 = sbr.rel (!%p23_p5) target bundleno = 10 (0xa), region = 112 }
 0x15c   :  { %779 = vsyncpa [#allocation3], 1 }
 0x15d   :  { %781 = vsyncpa [#allocation3 + $0x1], 1 }
 0x15e   :  { %782 = vsyncpa [#allocation6], 1 }
 0x15f   :  { %783 = vsyncpa [#allocation4], 1 }
 0x160   :  { %785 = vsyncpa [#allocation4 + $0x1], 1 }
 0x161   :  { %786 = vsyncpa [#allocation10], 1 }
 0x162   :  { %788 = vsyncpa [#allocation10 + $0x1], 1 }

// kernel: tpu_custom_call.1
= control target key start
LH: loop header
LB: loop body
LE: loop exit
PB: predicated region body
PF: predicated region fallthrough
CT: control target
= control target key end

     0   :  { %s1566_s0 = inlined_call_operand.vmem [shape: bf16[16,24], index: 0, kind: input, shape index: {}]   ;;  %s1567_s1 = inlined_call_operand.vmem [shape: bf16[16,8], index: 1, kind: input, shape index: {}]   ;;  %s1568_s2 = inlined_call_operand.hbm [shape: bf16[24,256], index: 2, kind: input, shape index: {}]   ;;  %s1569_s3 = inlined_call_operand.hbm [shape: bf16[8,256], index: 3, kind: input, shape index: {}]   ;;  %s1570_s4 = inlined_call_operand.vmem [shape: f32[1,256], index: 4, kind: input, shape index: {}]   ;;  %s1571_s5 = inlined_call_operand.hbm [shape: bf16[128,512], index: 5, kind: input, shape index: {}]   ;;  %s1572_s6 = inlined_call_operand.hbm [shape: bf16[16,128], index: 6, kind: output, shape index: {0}]   ;;  %s1573_s7 = inlined_call_operand.hbm [shape: bf16[16,512], index: 7, kind: output, shape index: {1}]  }
   0x1   :  { %1574 = sst [smem:[#allocation15_spill]] %s1568_s2 }
   0x2   :  { %1575 = sst [smem:[#allocation16_spill]] %s1569_s3 }
   0x3   :  { %13 = vsyncpa [#allocation3], 0 }
   0x4   :  { %14 = vsyncpa [#allocation6], 0 }
   0x5   :  { %15 = vsyncpa [#allocation4], 0 }
   0x6   :  { %17 = vsyncpa [#allocation4 + $0x1], 0 }
   0x7   :  { %18 = vsyncpa [#allocation10], 0 }
   0x8   :  { %20 = vsyncpa [#allocation10 + $0x1], 0  ;;  %s1402_s24 = smov 0   ;;  %s1404_s25 = smov 0  }
   0x9   :  { %s1406_s26 = smov 0   ;;  %s1408_s27 = smov 0  }
   0xa LB: > { %s1423_s28 = sadd.s32 4294967295, %s1353_s27   ;;  %s886_s29 = sadd.s32 4294967294, %s1353_s27   ;;  %s1353_s27 = sphi %s1408_s27, %s1585_s27   ;;  %s1349_s26 = sphi %s1406_s26, %s1584_s26   ;;  %s1345_s25 = sphi %s1404_s25, %s1583_s25   ;;  %s1341_s24 = sphi %s1402_s24, %s1582_s24  }
   0xb   : > { %s1427_s30 = sadd.s32 1, %s1353_s27   ;;  %s169_s8 = sadd.s32 1, %s1349_s26 }
   0xc   : > { %s166_s9 = ssub.s32 %s1353_s27, %s1427_s30  ;;  %p179_p0 = scmp.ne.s32.totalorder %s1349_s26, %s1345_s25 }
   0xd   : > { %p167_p1 = scmp.eq.s32.totalorder %s166_s9, 0  ;;  %p180_p2 = scmp.eq.s32.totalorder %s1423_s28, 1 }
   0xe   : > { %p185_p3 = scmp.ne.s32.totalorder %s1345_s25, %s1341_s24  ;;  %p186_p4 = scmp.eq.s32.totalorder %s886_s29, 1 }
   0xf   : > { %s1438_s10 = scalar_select %p167_p1, %s1349_s26, %s169_s8  }
  0x10   : > { %p1440_p5 = por %p180_p2, %p179_p0  ;;  %p1444_p6 = por %p186_p4, %p185_p3 }
  0x11   : > { %p887_p7 = scmp.ge.s32.totalorder %s1353_s27, 1  ;;  %p219_p8 = scmp.lt.s32.totalorder %s1353_s27, 3 }
  0x12   : > { %p1115_p9 = scmp.eq.s32.totalorder %s1423_s28, 0  ;;  %s1579_s3 = sld [smem:[#allocation16_spill]] }
  0x13   : > { %p1451_p10 = pnand %p887_p7, %p219_p8  ;;  %s1355_s17 = smov [#allocation5]  }
  0x14   : > { %s247_s18 = sshll.u32 %s1355_s17, 4  ;;  %s1580_s2 = sld [smem:[#allocation15_spill]]  ;;  %s248_s18 = int_to_ptr.vmem [resolvable:$true] %s247_s18 }
  0x15   : > { %p1098_p11 = pneg %p1451_p10  ;;  %s1356_s23 = smov [#allocation2]  }
  0x16   : > { %s232_s29 = sshll.u32 %s1356_s23, 4  ;;  %s1357_s8 = smov 128   ;;  %s233_s29 = int_to_ptr.vmem [resolvable:$true] %s232_s29 }
  0x17   : > { %p1465_p12 = pnand %p1115_p9, %p1098_p11  ;;  %s1358_s9 = smov 8  }
  0x18   : > { %s245_s16 = sshll.u32 %s1579_s3, 4  ;;  %s259_s17 = sshll.u32 %s1571_s5, 4  ;;  %s246_s16 = int_to_ptr.hbm [resolvable:$true] %s245_s16  ;;  %s260_s17 = int_to_ptr.hbm [resolvable:$true] %s259_s17 }
  0x19   : > { %1104 = dma.hbm_to_vmem [thread:$0]  (!%p1465_p12), %s246_s16, 128, %s248_s18, [#allocation6]  }
  0x1a   : > { %s230_s21 = sshll.u32 %s1580_s2, 4  ;;  %s1359_s19 = smov [#allocation7]   ;;  %s231_s21 = int_to_ptr.hbm [resolvable:$true] %s230_s21 }
  0x1b   : > { %1101 = dma.hbm_to_vmem [thread:$0]  (!%p1465_p12), %s231_s21, 384, %s233_s29, [#allocation3], %s1357_s8, %s1357_s8, %s1358_s9  }
  0x1c   : > { %s261_s20 = sshll.u32 %s1359_s19, 4  ;;  %s1360_s2 = smov 256   ;;  %s262_s20 = int_to_ptr.vmem [resolvable:$true] %s261_s20 }
  0x1d   : > { %s1361_s3 = smov 16   ;;  %291 = sbr.rel (%p1451_p10) target bundleno = 332 (0x14c), region = 44 }
  0x1e   : > { %1107 = dma.hbm_to_vmem [thread:$0]  (!%p1465_p12), %s260_s17, 4096, %s262_s20, [#allocation6], %s1360_s2, %s1360_s2, %s1361_s3  }
  0x22   : > { %1324 = dma.done.wait (%p1115_p9), [#allocation3], 384  }
  0x23   : > { %1326 = vsyncadd (%p1115_p9), [#allocation3], 4294966912 }
  0x24   : > { %1328 = dma.done.wait (%p1115_p9), [#allocation6], 4224  }
  0x25   : > { %1330 = vsyncadd (%p1115_p9), [#allocation6], 4294963072  ;;  %p342_p13 = scmp.lt.s32.totalorder %s1423_s28, 1  ;;  %v354_v0 = vld [vmem:[#allocation2 + $0x10] sm:$0xff]  ;;  %vm366_vm0 = vcmask 1043456   ;;  %v356_v1 = vld [vmem:[#allocation5] sm:$0xff] }
  0x26   : > { %vm362_vm1 = vcmask 64512   ;;  %v407_v2 = vunpack.c.h.b16 %v354_v0  ;;  %v359_v3 = vunpack.c.h.b16 %v356_v1  ;;  %v1047_v4 = vld [vmem:[#allocation2 + $0x4] sm:$0xf]  ;;  %v906_v5 = vld [vmem:[#allocation2 + $0x8] sm:$0xf0]  ;;  %v406_v6 = vunpack.c.l.b16 %v354_v0  ;;  %s1515_s9 = sand.u32 1, %s1345_s25  }
  0x27   : > { %s1490_s16 = scalar_select %p342_p13, %s1423_s28, 1  ;;  %v358_v7 = vunpack.c.l.b16 %v356_v1  ;;  %v904_v8 = vld [vmem:[#allocation2] sm:$0xf]  ;;  %v1048_v9 = vld [vmem:[#allocation2 + $0x4] sm:$0xf0]  ;;  %v909_v29 = vor.u32 %v1047_v4, %v906_v5  ;;  %vm414_vm2 = vcmask 195584  }
  0x28   : > { %v1026_v10 = vld [vmem:[#allocation7 + $0xe0] sm:$0xf]  ;;  %v411_v11 = vpack.c.b16 %v407_v2, %v407_v2  ;;  %v361_v12 = vpack.c.b16 %v359_v3, %v359_v3  ;;  %v410_v13 = vpack.c.b16 %v406_v6, %v406_v6  ;;  %v1079_v15 = vld [vmem:[#allocation7 + $0xec] sm:$0xf0]  ;;  %v1077_v16 = vld [vmem:[#allocation7 + $0xe4] sm:$0xf]  ;;  %v905_v33 = vor.u32 %v1048_v9, %v904_v8 }
  0x29   : > { %s898_s2 = sshll.u32 %s1490_s16, 2  ;;  %v360_v14 = vpack.c.b16 %v358_v7, %v358_v7  ;;  %v1028_v17 = vld [vmem:[#allocation7 + $0xf0] sm:$0xf0]  ;;  %v1027_v19 = vor.u32 %v1079_v15, %v1026_v10  ;;  %v1034_v21 = vld [vmem:[#allocation7 + $0xe8] sm:$0xf]  ;;  %s896_s14 = sshll.u32 %s1515_s9, 2 }
  0x2a   : > { %s349_s18 = scalar_lea.vmem %s1567_s1, %s898_s2  ;;  %v1031_v20 = vor.u32 %v1077_v16, %v1028_v17  ;;  %v1080_v22 = vld [vmem:[#allocation7 + $0xf4] sm:$0xf0]  ;;  %v1078_v23 = vld [vmem:[#allocation7 + $0xec] sm:$0xf]  ;;  %v422_v24 = vsel %vm366_vm0, %v411_v11, 0  ;;  %v371_v25 = vsel %vm366_vm0, %v361_v12, 0  ;;  %s345_s23 = scalar_lea.vmem %s1566_s0, %s898_s2 }
  0x2b   : > { %v355_v18 = vld [vmem:[%s349_s18] sm:$0xf]  ;;  %v419_v26 = vsel %vm366_vm0, %v410_v13, 0  ;;  %v368_v27 = vsel %vm366_vm0, %v360_v14, 0  ;;  %v1036_v28 = vld [vmem:[#allocation7 + $0xf8] sm:$0xf0]  ;;  %443 = vmatpush.bf16.msra.mxu3 %v422_v24  ;;  %393 = vmatpush.bf16.msra.mxu1 %v371_v25  ;;  %v1035_v36 = vor.u32 %v1080_v22, %v1034_v21 }
  0x2c   : > { %v1010_v30 = vld [vmem:[#allocation7 + $0xc0] sm:$0xf]  ;;  %v1075_v31 = vld [vmem:[#allocation7 + $0xcc] sm:$0xf0]  ;;  %v1073_v32 = vld [vmem:[#allocation7 + $0xc4] sm:$0xf]  ;;  %430 = vmatpush.bf16.msra.mxu2 %v419_v26  ;;  %380 = vmatpush.bf16.msra.mxu0 %v368_v27  ;;  %v1039_v34 = vor.u32 %v1078_v23, %v1036_v28 }
  0x2d   : > { %v1012_v35 = vld [vmem:[#allocation7 + $0xd0] sm:$0xf0]  ;;  %v1011_v37 = vor.u32 %v1075_v31, %v1010_v30  ;;  %v1018_v38 = vld [vmem:[#allocation7 + $0xc8] sm:$0xf]  ;;  %v1074_v39 = vld [vmem:[#allocation7 + $0xcc] sm:$0xf] }
  0x2e   : > { %v1020_v40 = vld [vmem:[#allocation7 + $0xd8] sm:$0xf0]  ;;  %901 = vmatmul.msk.bf16.vlgmr.msra.gmra.mxu1 %vm362_vm1, %v355_v18  ;;  %v1015_v41 = vor.u32 %v1073_v32, %v1012_v35  ;;  %v1076_v42 = vld [vmem:[#allocation7 + $0xd4] sm:$0xf0]  ;;  %v994_v43 = vld [vmem:[#allocation7 + $0xa0] sm:$0xf] }
  0x2f   : > { %672 = vmatpush.bf16.msrb.mxu1 %v1031_v20  ;;  %v1071_v44 = vld [vmem:[#allocation7 + $0xac] sm:$0xf0]  ;;  %444 = vmatpush.bf16.msra.mxu3 %v909_v29  ;;  %v351_v45 = vld [vmem:[%s345_s23] sm:$0xf]  ;;  %v1069_v46 = vld [vmem:[#allocation7 + $0xa4] sm:$0xf]  ;;  %v1023_v48 = vor.u32 %v1074_v39, %v1020_v40  ;;  %v1019_v49 = vor.u32 %v1076_v42, %v1018_v38 }
  0x30   : > { %659 = vmatpush.bf16.msrb.mxu0 %v1027_v19  ;;  %v996_v47 = vld [vmem:[#allocation7 + $0xb0] sm:$0xf0]  ;;  %431 = vmatpush.bf16.msra.mxu2 %v905_v33  ;;  %v995_v50 = vor.u32 %v1071_v44, %v994_v43  ;;  %v1002_v51 = vld [vmem:[#allocation7 + $0xa8] sm:$0xf]  ;;  %v1070_v52 = vld [vmem:[#allocation7 + $0xac] sm:$0xf] }
  0x31   : > { %900 = vmatmul.msk.bf16.vlgmr.msra.gmra.mxu0 %vm362_vm1, %v355_v18  ;;  %v1004_v53 = vld [vmem:[#allocation7 + $0xb8] sm:$0xf0]  ;;  %v999_v54 = vor.u32 %v1069_v46, %v996_v47  ;;  %v1072_v55 = vld [vmem:[#allocation7 + $0xb4] sm:$0xf0]  ;;  %v978_v56 = vld [vmem:[#allocation7 + $0x80] sm:$0xf] }
  0x32   : > { %911 = vmatmul.msk.bf16.vlgmr.msra.gmra.mxu3 %vm414_vm2, %v351_v45  ;;  %v1067_v57 = vld [vmem:[#allocation7 + $0x8c] sm:$0xf0]  ;;  %v1065_v58 = vld [vmem:[#allocation7 + $0x84] sm:$0xf]  ;;  %v980_v59 = vld [vmem:[#allocation7 + $0x90] sm:$0xf0]  ;;  %v1007_v60 = vor.u32 %v1070_v52, %v1004_v53  ;;  %v1003_v61 = vor.u32 %v1072_v55, %v1002_v51 }
  0x33   : > { %698 = vmatpush.bf16.msrb.mxu3 %v1039_v34  ;;  %673 = vmatpush.bf16.msrb.mxu1 %v1015_v41  ;;  %v979_v62 = vor.u32 %v1067_v57, %v978_v56  ;;  %v1066_v63 = vld [vmem:[#allocation7 + $0x8c] sm:$0xf]  ;;  %v988_v0 = vld [vmem:[#allocation7 + $0x98] sm:$0xf0]  ;;  %v983_v1 = vor.u32 %v1065_v58, %v980_v59  ;;  %v986_v2 = vld [vmem:[#allocation7 + $0x88] sm:$0xf] }
  0x34   : > { %685 = vmatpush.bf16.msrb.mxu2 %v1035_v36  ;;  %660 = vmatpush.bf16.msrb.mxu0 %v1011_v37  ;;  %v1068_v3 = vld [vmem:[#allocation7 + $0x94] sm:$0xf0]  ;;  %v991_v4 = vor.u32 %v1066_v63, %v988_v0  ;;  %v962_v6 = vld [vmem:[#allocation7 + $0x60] sm:$0xf]  ;;  %v1063_v7 = vld [vmem:[#allocation7 + $0x6c] sm:$0xf0] }
  0x35   : > { %910 = vmatmul.msk.bf16.vlgmr.msra.gmra.mxu2 %vm414_vm2, %v351_v45  ;;  %v987_v5 = vor.u32 %v1068_v3, %v986_v2  ;;  %v1061_v8 = vld [vmem:[#allocation7 + $0x64] sm:$0xf]  ;;  %v963_v9 = vor.u32 %v1063_v7, %v962_v6  ;;  %v964_v10 = vld [vmem:[#allocation7 + $0x70] sm:$0xf0]  ;;  %v970_v11 = vld [vmem:[#allocation7 + $0x68] sm:$0xf] }
  0x36   : > { %v1064_v12 = vld [vmem:[#allocation7 + $0x74] sm:$0xf0]  ;;  %v967_v13 = vor.u32 %v1061_v8, %v964_v10  ;;  %v1062_v15 = vld [vmem:[#allocation7 + $0x6c] sm:$0xf]  ;;  %v972_v16 = vld [vmem:[#allocation7 + $0x78] sm:$0xf0] }
  0x37   : > { %699 = vmatpush.bf16.msrb.mxu3 %v1023_v48  ;;  %674 = vmatpush.bf16.msrb.mxu1 %v999_v54  ;;  %v971_v14 = vor.u32 %v1064_v12, %v970_v11  ;;  %v946_v17 = vld [vmem:[#allocation7 + $0x40] sm:$0xf]  ;;  %v975_v18 = vor.u32 %v1062_v15, %v972_v16  ;;  %v1059_v19 = vld [vmem:[#allocation7 + $0x4c] sm:$0xf0]  ;;  %v1057_v20 = vld [vmem:[#allocation7 + $0x44] sm:$0xf] }
  0x38   : > { %686 = vmatpush.bf16.msrb.mxu2 %v1019_v49  ;;  %661 = vmatpush.bf16.msrb.mxu0 %v995_v50  ;;  %v948_v21 = vld [vmem:[#allocation7 + $0x50] sm:$0xf0]  ;;  %v947_v22 = vor.u32 %v1059_v19, %v946_v17  ;;  %v954_v24 = vld [vmem:[#allocation7 + $0x48] sm:$0xf]  ;;  %v1060_v25 = vld [vmem:[#allocation7 + $0x54] sm:$0xf0] }
  0x39   : > { %v951_v23 = vor.u32 %v1057_v20, %v948_v21  ;;  %v1058_v26 = vld [vmem:[#allocation7 + $0x4c] sm:$0xf]  ;;  %v955_v27 = vor.u32 %v1060_v25, %v954_v24  ;;  %v956_v28 = vld [vmem:[#allocation7 + $0x58] sm:$0xf0]  ;;  %v930_v30 = vld [vmem:[#allocation7 + $0x20] sm:$0xf] }
  0x3a   : > { %v959_v29 = vor.u32 %v1058_v26, %v956_v28  ;;  %v1055_v31 = vld [vmem:[#allocation7 + $0x2c] sm:$0xf0]  ;;  %v1053_v33 = vld [vmem:[#allocation7 + $0x24] sm:$0xf]  ;;  %v932_v34 = vld [vmem:[#allocation7 + $0x30] sm:$0xf0] }
  0x3b   : > { %700 = vmatpush.bf16.msrb.mxu3 %v1007_v60  ;;  %675 = vmatpush.bf16.msrb.mxu1 %v983_v1  ;;  %v931_v32 = vor.u32 %v1055_v31, %v930_v30  ;;  %v935_v35 = vor.u32 %v1053_v33, %v932_v34  ;;  %v938_v36 = vld [vmem:[#allocation7 + $0x28] sm:$0xf]  ;;  %v1056_v37 = vld [vmem:[#allocation7 + $0x34] sm:$0xf0]  ;;  %v1054_v38 = vld [vmem:[#allocation7 + $0x2c] sm:$0xf] }
  0x3c   : > { %687 = vmatpush.bf16.msrb.mxu2 %v1003_v61  ;;  %662 = vmatpush.bf16.msrb.mxu0 %v979_v62  ;;  %v939_v39 = vor.u32 %v1056_v37, %v938_v36  ;;  %v940_v40 = vld [vmem:[#allocation7 + $0x38] sm:$0xf0]  ;;  %v914_v42 = vld [vmem:[#allocation7] sm:$0xf]  ;;  %v1051_v43 = vld [vmem:[#allocation7 + $0xc] sm:$0xf0] }
  0x3d   : > { %v943_v41 = vor.u32 %v1054_v38, %v940_v40  ;;  %v1049_v44 = vld [vmem:[#allocation7 + $0x4] sm:$0xf]  ;;  %v915_v45 = vor.u32 %v1051_v43, %v914_v42  ;;  %v916_v46 = vld [vmem:[#allocation7 + $0x10] sm:$0xf0]  ;;  %v922_v47 = vld [vmem:[#allocation7 + $0x8] sm:$0xf] }
  0x3e   : > { %v1052_v48 = vld [vmem:[#allocation7 + $0x14] sm:$0xf0]  ;;  %v919_v49 = vor.u32 %v1049_v44, %v916_v46  ;;  %v1050_v51 = vld [vmem:[#allocation7 + $0xc] sm:$0xf]  ;;  %v924_v52 = vld [vmem:[#allocation7 + $0x18] sm:$0xf0] }
  0x3f   : > { %701 = vmatpush.bf16.msrb.mxu3 %v991_v4  ;;  %676 = vmatpush.bf16.msrb.mxu1 %v967_v13  ;;  %v923_v50 = vor.u32 %v1052_v48, %v922_v47  ;;  %v927_v53 = vor.u32 %v1050_v51, %v924_v52  ;;  %v450_v56 = vld [vmem:[%s1570_s4] sm:$0x3]  ;;  %s334_s15 = scalar_lea.vmem [#allocation8], %s896_s14  ;;  %s1042_s17 = sshll.u32 %s1423_s28, 2 }
  0x40   : > { %688 = vmatpush.bf16.msrb.mxu2 %v987_v5  ;;  %663 = vmatpush.bf16.msrb.mxu0 %v963_v9  ;;  %v453_v58 = vperm.slane %v450_v56, 1  ;;  %v452_v61 = vperm.slane %v450_v56, 0  ;;  %s731_s16 = scalar_lea.hbm %s1572_s6, %s1042_s17  ;;  %s733_s2 = sshll.u32 %s334_s15, 4  ;;  %s734_s2 = int_to_ptr.vmem [resolvable:$true] %s733_s2 }
  0x41   : > { %s735_s3 = sshll.u32 %s731_s16, 4  ;;  %s716_s13 = scalar_lea.sflag [#allocation4], %s1515_s9  ;;  %s736_s3 = int_to_ptr.hbm [resolvable:$true] %s735_s3 }
  0x42   : > { %s1265_s18 = sshra.s32 %s736_s3, 4  ;;  %s1271_s29 = scalar_lea.hbm %s1572_s6, 8  ;;  %s1266_s18 = int_to_ptr.hbm [resolvable:$true] %s1265_s18 }
  0x43   : > { %702 = vmatpush.bf16.msrb.mxu3 %v975_v18  ;;  %677 = vmatpush.bf16.msrb.mxu1 %v951_v23  ;;  %s1267_s21 = scalar_lea.hbm %s1266_s18, 4  ;;  %p1272_p3 = scmp.lt.s32.totalorder %s1266_s18, %s1572_s6 }
  0x44   : > { %689 = vmatpush.bf16.msrb.mxu2 %v971_v14  ;;  %664 = vmatpush.bf16.msrb.mxu0 %v947_v22  ;;  %p1268_p0 = scmp.ne.s32.totalorder %s1266_s18, %s1267_s21  ;;  %p1273_p4 = scmp.lt.s32.totalorder %s1271_s29, %s1267_s21 }
  0x46   : > { %p1269_p1 = pnand %p1268_p0, %p1440_p5  ;;  %p1274_p7 = por %p1273_p4, %p1272_p3 }
  0x47   : > { %703 = vmatpush.bf16.msrb.mxu3 %v959_v29  ;;  %678 = vmatpush.bf16.msrb.mxu1 %v935_v35 }
  0x48   : > { %690 = vmatpush.bf16.msrb.mxu2 %v955_v27  ;;  %665 = vmatpush.bf16.msrb.mxu0 %v931_v32  ;;  %p1270_p2 = pneg %p1269_p1 }
  0x4a   : > { %p1275_p8 = pnand %p1274_p7, %p1270_p2 }
  0x4b   : > { %704 = vmatpush.bf16.msrb.mxu3 %v943_v41  ;;  %679 = vmatpush.bf16.msrb.mxu1 %v919_v49 }
  0x4c   : > { %691 = vmatpush.bf16.msrb.mxu2 %v939_v39  ;;  %666 = vmatpush.bf16.msrb.mxu0 %v915_v45 }
  0x4f   : > { %705 = vmatpush.bf16.msrb.mxu3 %v927_v53 }
  0x50   : > { %692 = vmatpush.bf16.msrb.mxu2 %v923_v50 }
  0xab   : > { %v395_v54 = vpop.f32.mrf.mxu1 }
  0xae   : > { %v382_v55 = vpop.f32.mrf.mxu0 }
  0xb3   : > { %v397_v57 = vpop.f32.mrf.mxu1 }
  0xb5   : > { %v446_v60 = vpop.f32.mrf.mxu3 }
  0xb6   : > { %v384_v59 = vpop.f32.mrf.mxu0  ;;  %v447_v62 = vadd.f32 %v446_v60, %v395_v54 }
  0xb8   : > { %v433_v63 = vpop.f32.mrf.mxu2  ;;  %v457_v1 = vadd.f32 %v453_v58, %v447_v62 }
  0xb9   : > { %v434_v0 = vadd.f32 %v433_v63, %v382_v55 }
  0xba   : > { %vm459_vm3 = vcmp.gt.f32.partialorder %v457_v1, 0.0  ;;  %v461_v3 = vmul.f32 0.1, %v457_v1 }
  0xbb   : > { %v456_v2 = vadd.f32 %v452_v61, %v434_v0 }
  0xbc   : > { %v463_v5 = vsel %vm459_vm3, %v457_v1, %v461_v3 }
  0xbd   : > { %vm458_vm4 = vcmp.gt.f32.partialorder %v456_v2, 0.0  ;;  %v460_v4 = vmul.f32 0.1, %v456_v2  ;;  %v466_v6 = vpack.c.bf16 %v463_v5, %v463_v5  ;;  %v448_v7 = vpop.f32.mrf.mxu3 }
  0xbf   : > { %v462_v8 = vsel %vm458_vm4, %v456_v2, %v460_v4  ;;  %667 = vmatmul.bf16.vlgmr.msrb.gmra.mxu0 %v466_v6  ;;  %680 = vmatmul.bf16.vlgmr.msrb.gmra.mxu1 %v466_v6 }
  0xc0   : > { %v464_v9 = vpack.c.bf16 %v462_v8, %v462_v8  ;;  %v435_v10 = vpop.f32.mrf.mxu2  ;;  %693 = vmatmul.bf16.vlgmr.msrb.gmra.mxu2 %v466_v6  ;;  %706 = vmatmul.bf16.vlgmr.msrb.gmra.mxu3 %v466_v6 }
  0xc2   : > { %465 = vst [vmem:[%s334_s15] sm:$0xf] %v464_v9 }
  0xc3   : > { %1278 = shalt.err (!%p1275_p8)
}
  0xc4   : > { %1094 = dma.vmem_to_hbm [thread:$0]  (%p1440_p5), %s734_s2, 64, %s736_s3, %s716_s13  }
  0xc5   : > { %s897_s15 = sshll.u32 %s1515_s9, 4  ;;  %s1081_s17 = sshll.u32 %s1423_s28, 4 }
  0xc6   : > { %s746_s16 = scalar_lea.hbm %s1573_s7, %s1081_s17  ;;  %s341_s18 = scalar_lea.vmem [#allocation9], %s897_s15 }
  0xc7   : > { %s748_s21 = sshll.u32 %s341_s18, 4  ;;  %s750_s22 = sshll.u32 %s746_s16, 4  ;;  %s749_s21 = int_to_ptr.vmem [resolvable:$true] %s748_s21  ;;  %s751_s22 = int_to_ptr.hbm [resolvable:$true] %s750_s22 }
  0xc8   : > { %s721_s28 = scalar_lea.sflag [#allocation10], %s1515_s9  ;;  %s1293_s2 = sshra.s32 %s751_s22, 4  ;;  %s1294_s2 = int_to_ptr.hbm [resolvable:$true] %s1293_s2 }
  0xc9   : > { %s1295_s3 = scalar_lea.hbm %s1294_s2, 16  ;;  %s1299_s29 = scalar_lea.hbm %s1573_s7, 32 }
  0xca   : > { %p1296_p9 = scmp.ne.s32.totalorder %s1294_s2, %s1295_s3  ;;  %p1300_p12 = scmp.lt.s32.totalorder %s1294_s2, %s1573_s7 }
  0xcb   : > { %p1301_p13 = scmp.lt.s32.totalorder %s1299_s29, %s1295_s3 }
  0xcc   : > { %p1297_p10 = pnand %p1296_p9, %p1440_p5 }
  0xcd   : > { %p1302_p0 = por %p1301_p13, %p1300_p12 }
  0xce   : > { %p1298_p11 = pneg %p1297_p10 }
  0xd0   : > { %p1303_p1 = pnand %p1302_p0, %p1298_p11 }
 0x13c   : > { %v668_v11 = vpop.f32.mrf.mxu0  ;;  %v681_v12 = vpop.f32.mrf.mxu1 }
 0x13d   : > { %v711_v13 = vpack.c.bf16 %v681_v12, %v668_v11 }
 0x13f   : > { %713 = vst [vmem:[%s341_s18] sm:$0xff] %v711_v13 }
 0x143   : > { %v694_v14 = vpop.f32.mrf.mxu2  ;;  %v707_v15 = vpop.f32.mrf.mxu3 }
 0x144   : > { %v712_v16 = vpack.c.bf16 %v707_v15, %v694_v14  ;;  %v670_v17 = vpop.f32.mrf.mxu0  ;;  %v683_v18 = vpop.f32.mrf.mxu1 }
 0x146   : > { %714 = vst [vmem:[%s341_s18 + $0x8] sm:$0xff] %v712_v16 }
 0x147   : > { %1306 = shalt.err (!%p1303_p1)
}
 0x148   : > { %1095 = dma.vmem_to_hbm [thread:$0]  (%p1440_p5), %s749_s21, 256, %s751_s22, %s721_s28  }
 0x14b   : > { %v696_v19 = vpop.f32.mrf.mxu2  ;;  %v709_v20 = vpop.f32.mrf.mxu3 }
 0x14c PF: > { %p1121_p2 = scmp.ge.s32.totalorder %s1353_s27, 2  ;;  %s762_s9 = sand.u32 1, %s1341_s24  }
 0x14d   : > { %s763_s15 = scalar_lea.sflag [#allocation4], %s762_s9 }
 0x14e   : > { %p1109_p3 = pnand %p1121_p2, %p1444_p6 }
 0x150   : > { %p1110_p4 = pneg %p1109_p3 }
 0x152   : > { %1332 = dma.done.wait (%p1110_p4), %s763_s15, 64  }
 0x153   : > { %1334 = vsyncadd (%p1110_p4), %s763_s15, 4294967232  ;;  %s773_s17 = scalar_lea.sflag [#allocation10], %s762_s9 }
 0x154   : > { %1336 = dma.done.wait (%p1110_p4), %s773_s17, 256  }
 0x155   : > { %1338 = vsyncadd (%p1110_p4), %s773_s17, 4294967040  ;;  %p23_p5 = scmp.ge.s32.totalorder %s1427_s30, 4   ;;  %s1582_s24 = smov %s1345_s25 }
 0x156   : > { %s1583_s25 = smov %s1349_s26  ;;  %s1584_s26 = smov %s1438_s10 }
 0x157   : > { %s1585_s27 = smov %s1427_s30  ;;  %25 = sbr.rel (!%p23_p5) target bundleno = 10 (0xa), region = 112 }
 0x15c   :  { %779 = vsyncpa [#allocation3], 1 }
 0x15d   :  { %781 = vsyncpa [#allocation3 + $0x1], 1 }
 0x15e   :  { %782 = vsyncpa [#allocation6], 1 }
 0x15f   :  { %783 = vsyncpa [#allocation4], 1 }
 0x160   :  { %785 = vsyncpa [#allocation4 + $0x1], 1 }
 0x161   :  { %786 = vsyncpa [#allocation10], 1 }
 0x162   :  { %788 = vsyncpa [#allocation10 + $0x1], 1 }

</bundles_post_ra>
